<compile_context>
chip_gen: v7x
topology: tpu7x:2x2x1
jax: 0.10.0
libtpu: 0.0.40
codegen_flags: <defaults>
</compile_context>

<pallas_src>
import jax
import jax.numpy as jnp
from jax import lax
from jax.experimental import pallas as pl
from jax.experimental.pallas import tpu as pltpu

HIDDEN = 64
INPUT = 1


def lstm_kernel(x_ref, wrow_ref, brow_ref, wcomb_ref, wfc_ref, bfc_ref, out_ref):
    """Wavefronted 2-layer LSTM recurrence.

    x_ref    : (T+1, B, 1) per-wavefront-step scalar input; row T is a dummy (its layer-0
               result is never consumed).
    wrow_ref : (1, 8H) interleaved layer-0 input-projection row [wih0_i,0,wih0_f,0,...]
               (zeros in the layer-1 column blocks).
    brow_ref : (1, 8H) interleaved biases [b0_i,b1_i,b0_f,b1_f,...] (b_ih + b_hh folded).
    wcomb_ref: (2H, 8H) combined recurrent weight [[whh0, wih1], [0, whh1]] per gate block.
    wfc_ref  : (1, 2H) fc weight, zero in the layer-0 half.
    bfc_ref  : (1, 1) fc bias.
    out_ref  : (B, 1) output.
    """
    Tp1, B, _ = x_ref.shape
    G = wcomb_ref.shape[1]
    H2 = G // 4            # 2H = 128 -> exactly one lane-full vreg row
    H = H2 // 2

    wcomb = wcomb_ref[...]
    wrow = wrow_ref[...]
    brow = brow_ref[...]

    # 1 in layer-0 columns, 0 in layer-1 columns (only used at wavefront step 0).
    mask0 = (lax.broadcasted_iota(jnp.int32, (1, H2), 1) < H).astype(jnp.float32)

    def sigmoid(v):
        # Exactly one EUP op (tanh) per sigmoid instead of exp + reciprocal.
        return 0.5 * jnp.tanh(0.5 * v) + 0.5

    def gate_math(g, ccat):
        # All slices are 128-lane aligned; each holds [layer0 | layer1] halves which line up
        # elementwise with ccat = [c0 | c1].
        i_b = sigmoid(g[:, 0 * H2:1 * H2])
        f_b = sigmoid(g[:, 1 * H2:2 * H2])
        g_b = jnp.tanh(g[:, 2 * H2:3 * H2])
        o_b = sigmoid(g[:, 3 * H2:4 * H2])
        ccat_new = f_b * ccat + i_b * g_b
        hcat_new = o_b * jnp.tanh(ccat_new)
        return hcat_new, ccat_new

    def gate_add(t):
        # Per-step additive gate term: layer-0 input projection (I == 1 -> scalar * row) + biases.
        # Independent of the carried state -> scheduled off the dependent chain.
        return x_ref[t] * wrow + brow                      # (B,1)*(1,8H)+(1,8H) -> (B,8H)

    # Wavefront step 0: hidden state is zero, so the recurrent matmul contributes nothing.
    # Layer 1 has not started yet -> zero its half of the state afterwards.
    h_tmp, c_tmp = gate_math(gate_add(0), jnp.zeros((B, H2), jnp.float32))
    hcat = h_tmp * mask0
    ccat = c_tmp * mask0

    # Static unroll: T is tiny; static indices give the LLO scheduler full freedom to overlap
    # each step's gate_add / EUP pushes with the previous step's dependent chain.
    for t in range(1, Tp1):
        # One MXU matmul per wavefront step: computes layer-0(t) and layer-1(t-1) gates.
        g = gate_add(t) + jnp.dot(hcat, wcomb, preferred_element_type=jnp.float32)
        hcat, ccat = gate_math(g, ccat)

    # fc on the last hidden state of the top layer: VPU multiply + lane reduce.
    # wfc_ref is zero over the (spurious) layer-0 half, so no slicing of hcat is needed.
    out = jnp.sum(hcat * wfc_ref[...], axis=-1, keepdims=True) + bfc_ref[...]
    out_ref[...] = out.astype(out_ref.dtype)


@jax.jit
def lstm_forward(x, params):
    """x: (B, T, I) float32 (PyTorch batch_first). Returns (B, 1) float32."""
    wih0, whh0, b0, wih1, whh1, b1, wfc, bfc = params
    B, T, I = x.shape
    H = whh0.shape[0]
    assert I == 1, "kernel specialises the input projection for input_size == 1"

    f32 = jnp.float32

    def gsplit(w):                                         # split 4H axis -> [i, f, g, o]
        return [w[..., k * H:(k + 1) * H] for k in range(4)]

    wih0_g, b0_g = gsplit(wih0), gsplit(b0)
    whh0_g, wih1_g, whh1_g, b1_g = gsplit(whh0), gsplit(wih1), gsplit(whh1), gsplit(b1)

    # --- parameter packing (fused by XLA into the same executable; one-time in a real model) ---
    # Interleaved layer-0 input-projection row (zeros in layer-1 column blocks) and biases.
    zIH = jnp.zeros((I, H), f32)
    wrow = jnp.concatenate([c for k in range(4) for c in (wih0_g[k], zIH)], axis=1)   # (1, 8H)
    brow = jnp.concatenate([c for k in range(4) for c in (b0_g[k], b1_g[k])], axis=1)  # (1, 8H)

    # Combined recurrent weight (2H, 8H):
    #   rows 0:H  (h0 contribution): [whh0_k | wih1_k] per gate k
    #   rows H:2H (h1 contribution): [   0   | whh1_k]
    zHH = jnp.zeros((H, H), f32)
    top = jnp.concatenate([c for k in range(4) for c in (whh0_g[k], wih1_g[k])], axis=1)
    bot = jnp.concatenate([c for k in range(4) for c in (zHH, whh1_g[k])], axis=1)
    wcomb = jnp.concatenate([top, bot], axis=0)                                        # (2H, 8H)

    # fc weight padded to (1, 2H) so the reduce against hcat = [h0 | h1] picks only h1.
    wfc_row = jnp.concatenate([jnp.zeros((1, H), f32), wfc.T], axis=1)

    # Wavefront-step inputs (T+1, B, 1); row T is a dummy (its layer-0 output is discarded).
    x_tm = jnp.transpose(x, (1, 0, 2)).astype(f32)                                     # (T, B, 1)
    x_steps = jnp.concatenate([x_tm, jnp.zeros((1, B, I), f32)], axis=0)               # (T+1, B, 1)

    vmem = pl.BlockSpec(memory_space=pltpu.MemorySpace.VMEM)
    out = pl.pallas_call(
        lstm_kernel,
        out_shape=jax.ShapeDtypeStruct((B, 1), jnp.float32),
        in_specs=[vmem] * 6,
        out_specs=vmem,
    )(x_steps, wrow, brow, wcomb, wfc_row, bfc)
    return out


def reference_forward(x, params):
    """Pure-JAX reference replicating nn.LSTM(batch_first=True, num_layers=2) + nn.Linear."""
    wih0, whh0, b0, wih1, whh1, b1, wfc, bfc = params
    B, T, I = x.shape
    H = whh0.shape[0]

    def cell(x_t, h, c, wih, whh, b):
        gates = x_t @ wih + h @ whh + b
        i = jax.nn.sigmoid(gates[:, 0 * H:1 * H])
        f = jax.nn.sigmoid(gates[:, 1 * H:2 * H])
        g = jnp.tanh(gates[:, 2 * H:3 * H])
        o = jax.nn.sigmoid(gates[:, 3 * H:4 * H])
        c_new = f * c + i * g
        return o * jnp.tanh(c_new), c_new

    def step(carry, x_t):
        h0, c0, h1, c1 = carry
        h0, c0 = cell(x_t, h0, c0, wih0, whh0, b0)
        h1, c1 = cell(h0, h1, c1, wih1, whh1, b1)
        return (h0, c0, h1, c1), None

    zeros = jnp.zeros((B, H), jnp.float32)
    (_, _, h1, _), _ = lax.scan(step, (zeros, zeros, zeros, zeros),
                                jnp.transpose(x, (1, 0, 2)))
    return h1 @ wfc + bfc


if __name__ == "__main__":
    B, T = 2, 8
    H, I = HIDDEN, INPUT

    key = jax.random.PRNGKey(0)
    keys = jax.random.split(key, 11)
    bound = 1.0 / (H ** 0.5)

    def u(k, shape):
        return jax.random.uniform(k, shape, jnp.float32, -bound, bound)

    # PyTorch shapes: weight_ih_l0 (4H, I), weight_hh_l0 (4H, H), biases (4H,);
    # stored here pre-transposed as (in, 4H), biases (b_ih + b_hh) combined into (1, 4H).
    wih0 = u(keys[0], (I, 4 * H))
    whh0 = u(keys[1], (H, 4 * H))
    b0 = u(keys[2], (1, 4 * H)) + u(keys[3], (1, 4 * H))
    wih1 = u(keys[4], (H, 4 * H))
    whh1 = u(keys[5], (H, 4 * H))
    b1 = u(keys[6], (1, 4 * H)) + u(keys[7], (1, 4 * H))
    wfc = u(keys[8], (H, 1))            # fc weight (1, H) transposed
    bfc = u(keys[9], (1, 1))            # fc bias

    x = jax.random.normal(keys[10], (B, T, I), jnp.float32)
    params = (wih0, whh0, b0, wih1, whh1, b1, wfc, bfc)

    out = jax.block_until_ready(lstm_forward(x, params))
    ref = jax.block_until_ready(reference_forward(x, params))
    assert out.shape == (B, 1)
    assert jnp.allclose(out, ref, atol=1e-4, rtol=1e-4), (out, ref)
    print("KERNEL_OK")
</pallas_src>

<mosaic_0001>
module attributes {stable_mosaic.version = 11 : i64} {
  func.func @lstm_kernel(%arg0: memref<9x2x1xf32, #tpu.memory_space<vmem>>, %arg1: memref<1x512xf32, #tpu.memory_space<vmem>>, %arg2: memref<1x512xf32, #tpu.memory_space<vmem>>, %arg3: memref<128x512xf32, #tpu.memory_space<vmem>>, %arg4: memref<1x128xf32, #tpu.memory_space<vmem>>, %arg5: memref<1x1xf32, #tpu.memory_space<vmem>>, %arg6: memref<2x1xf32, #tpu.memory_space<vmem>>) attributes {dimension_semantics = [], scalar_prefetch = 0 : i64, scratch_operands = 0 : i64, tpu.core_type = #tpu.core_type<tc>} {
    %c0 = arith.constant 0 : index
    %c0_0 = arith.constant 0 : index
    %0 = vector.load %arg3[%c0, %c0_0] : memref<128x512xf32, #tpu.memory_space<vmem>>, vector<128x512xf32>
    %c0_1 = arith.constant 0 : index
    %c0_2 = arith.constant 0 : index
    %1 = vector.load %arg1[%c0_1, %c0_2] : memref<1x512xf32, #tpu.memory_space<vmem>>, vector<1x512xf32>
    %c0_3 = arith.constant 0 : index
    %c0_4 = arith.constant 0 : index
    %2 = vector.load %arg2[%c0_3, %c0_4] : memref<1x512xf32, #tpu.memory_space<vmem>>, vector<1x512xf32>
    %3 = tpu.iota {dimensions = array<i32: 1>} : vector<1x128xi32>
    %c64_i32 = arith.constant 64 : i32
    %4 = vector.broadcast %c64_i32 : i32 to vector<1x128xi32>
    %5 = arith.cmpi slt, %3, %4 : vector<1x128xi32>
    %6 = arith.extui %5 : vector<1x128xi1> to vector<1x128xi32>
    %7 = arith.sitofp %6 : vector<1x128xi32> to vector<1x128xf32>
    %c0_5 = arith.constant 0 : index
    %c0_6 = arith.constant 0 : index
    %c0_7 = arith.constant 0 : index
    %8 = vector.load %arg0[%c0_5, %c0_6, %c0_7] : memref<9x2x1xf32, #tpu.memory_space<vmem>>, vector<1x2x1xf32>
    %9 = vector.shape_cast %8 : vector<1x2x1xf32> to vector<2x1xf32>
    %10 = vector.broadcast %9 : vector<2x1xf32> to vector<2x512xf32>
    %11 = vector.broadcast %1 : vector<1x512xf32> to vector<2x512xf32>
    %12 = arith.mulf %10, %11 : vector<2x512xf32>
    %13 = vector.broadcast %2 : vector<1x512xf32> to vector<2x512xf32>
    %14 = arith.addf %12, %13 : vector<2x512xf32>
    %cst = arith.constant 0.000000e+00 : f32
    %15 = vector.broadcast %cst : f32 to vector<2x128xf32>
    %16 = vector.extract_strided_slice %14 {offsets = [0, 0], sizes = [2, 128], strides = [1, 1]} : vector<2x512xf32> to vector<2x128xf32>
    %cst_8 = arith.constant 5.000000e-01 : f32
    %17 = vector.broadcast %cst_8 : f32 to vector<2x128xf32>
    %18 = arith.mulf %17, %16 : vector<2x128xf32>
    %19 = math.tanh %18 : vector<2x128xf32>
    %cst_9 = arith.constant 5.000000e-01 : f32
    %20 = vector.broadcast %cst_9 : f32 to vector<2x128xf32>
    %21 = arith.mulf %20, %19 : vector<2x128xf32>
    %cst_10 = arith.constant 5.000000e-01 : f32
    %22 = vector.broadcast %cst_10 : f32 to vector<2x128xf32>
    %23 = arith.addf %21, %22 : vector<2x128xf32>
    %24 = vector.extract_strided_slice %14 {offsets = [0, 128], sizes = [2, 128], strides = [1, 1]} : vector<2x512xf32> to vector<2x128xf32>
    %cst_11 = arith.constant 5.000000e-01 : f32
    %25 = vector.broadcast %cst_11 : f32 to vector<2x128xf32>
    %26 = arith.mulf %25, %24 : vector<2x128xf32>
    %27 = math.tanh %26 : vector<2x128xf32>
    %cst_12 = arith.constant 5.000000e-01 : f32
    %28 = vector.broadcast %cst_12 : f32 to vector<2x128xf32>
    %29 = arith.mulf %28, %27 : vector<2x128xf32>
    %cst_13 = arith.constant 5.000000e-01 : f32
    %30 = vector.broadcast %cst_13 : f32 to vector<2x128xf32>
    %31 = arith.addf %29, %30 : vector<2x128xf32>
    %32 = vector.extract_strided_slice %14 {offsets = [0, 256], sizes = [2, 128], strides = [1, 1]} : vector<2x512xf32> to vector<2x128xf32>
    %33 = math.tanh %32 : vector<2x128xf32>
    %34 = vector.extract_strided_slice %14 {offsets = [0, 384], sizes = [2, 128], strides = [1, 1]} : vector<2x512xf32> to vector<2x128xf32>
    %cst_14 = arith.constant 5.000000e-01 : f32
    %35 = vector.broadcast %cst_14 : f32 to vector<2x128xf32>
    %36 = arith.mulf %35, %34 : vector<2x128xf32>
    %37 = math.tanh %36 : vector<2x128xf32>
    %cst_15 = arith.constant 5.000000e-01 : f32
    %38 = vector.broadcast %cst_15 : f32 to vector<2x128xf32>
    %39 = arith.mulf %38, %37 : vector<2x128xf32>
    %cst_16 = arith.constant 5.000000e-01 : f32
    %40 = vector.broadcast %cst_16 : f32 to vector<2x128xf32>
    %41 = arith.addf %39, %40 : vector<2x128xf32>
    %42 = arith.mulf %31, %15 : vector<2x128xf32>
    %43 = arith.mulf %23, %33 : vector<2x128xf32>
    %44 = arith.addf %42, %43 : vector<2x128xf32>
    %45 = math.tanh %44 : vector<2x128xf32>
    %46 = arith.mulf %41, %45 : vector<2x128xf32>
    %47 = vector.broadcast %7 : vector<1x128xf32> to vector<2x128xf32>
    %48 = arith.mulf %46, %47 : vector<2x128xf32>
    %49 = vector.broadcast %7 : vector<1x128xf32> to vector<2x128xf32>
    %50 = arith.mulf %44, %49 : vector<2x128xf32>
    %c1 = arith.constant 1 : index
    %c0_17 = arith.constant 0 : index
    %c0_18 = arith.constant 0 : index
    %51 = vector.load %arg0[%c1, %c0_17, %c0_18] : memref<9x2x1xf32, #tpu.memory_space<vmem>>, vector<1x2x1xf32>
    %52 = vector.shape_cast %51 : vector<1x2x1xf32> to vector<2x1xf32>
    %53 = vector.broadcast %52 : vector<2x1xf32> to vector<2x512xf32>
    %54 = vector.broadcast %1 : vector<1x512xf32> to vector<2x512xf32>
    %55 = arith.mulf %53, %54 : vector<2x512xf32>
    %56 = vector.broadcast %2 : vector<1x512xf32> to vector<2x512xf32>
    %57 = arith.addf %55, %56 : vector<2x512xf32>
    %cst_19 = arith.constant dense<0.000000e+00> : vector<2x512xf32>
    %58 = tpu.matmul %48, %0, %cst_19 {dimension_numbers = #tpu.dot_dimension_numbers<[1], [0], [0], [1], [0, 0, 1, 1], [], []>} : vector<2x128xf32>, vector<128x512xf32>, vector<2x512xf32> -> vector<2x512xf32>
    %59 = arith.addf %57, %58 : vector<2x512xf32>
    %60 = vector.extract_strided_slice %59 {offsets = [0, 0], sizes = [2, 128], strides = [1, 1]} : vector<2x512xf32> to vector<2x128xf32>
    %cst_20 = arith.constant 5.000000e-01 : f32
    %61 = vector.broadcast %cst_20 : f32 to vector<2x128xf32>
    %62 = arith.mulf %61, %60 : vector<2x128xf32>
    %63 = math.tanh %62 : vector<2x128xf32>
    %cst_21 = arith.constant 5.000000e-01 : f32
    %64 = vector.broadcast %cst_21 : f32 to vector<2x128xf32>
    %65 = arith.mulf %64, %63 : vector<2x128xf32>
    %cst_22 = arith.constant 5.000000e-01 : f32
    %66 = vector.broadcast %cst_22 : f32 to vector<2x128xf32>
    %67 = arith.addf %65, %66 : vector<2x128xf32>
    %68 = vector.extract_strided_slice %59 {offsets = [0, 128], sizes = [2, 128], strides = [1, 1]} : vector<2x512xf32> to vector<2x128xf32>
    %cst_23 = arith.constant 5.000000e-01 : f32
    %69 = vector.broadcast %cst_23 : f32 to vector<2x128xf32>
    %70 = arith.mulf %69, %68 : vector<2x128xf32>
    %71 = math.tanh %70 : vector<2x128xf32>
    %cst_24 = arith.constant 5.000000e-01 : f32
    %72 = vector.broadcast %cst_24 : f32 to vector<2x128xf32>
    %73 = arith.mulf %72, %71 : vector<2x128xf32>
    %cst_25 = arith.constant 5.000000e-01 : f32
    %74 = vector.broadcast %cst_25 : f32 to vector<2x128xf32>
    %75 = arith.addf %73, %74 : vector<2x128xf32>
    %76 = vector.extract_strided_slice %59 {offsets = [0, 256], sizes = [2, 128], strides = [1, 1]} : vector<2x512xf32> to vector<2x128xf32>
    %77 = math.tanh %76 : vector<2x128xf32>
    %78 = vector.extract_strided_slice %59 {offsets = [0, 384], sizes = [2, 128], strides = [1, 1]} : vector<2x512xf32> to vector<2x128xf32>
    %cst_26 = arith.constant 5.000000e-01 : f32
    %79 = vector.broadcast %cst_26 : f32 to vector<2x128xf32>
    %80 = arith.mulf %79, %78 : vector<2x128xf32>
    %81 = math.tanh %80 : vector<2x128xf32>
    %cst_27 = arith.constant 5.000000e-01 : f32
    %82 = vector.broadcast %cst_27 : f32 to vector<2x128xf32>
    %83 = arith.mulf %82, %81 : vector<2x128xf32>
    %cst_28 = arith.constant 5.000000e-01 : f32
    %84 = vector.broadcast %cst_28 : f32 to vector<2x128xf32>
    %85 = arith.addf %83, %84 : vector<2x128xf32>
    %86 = arith.mulf %75, %50 : vector<2x128xf32>
    %87 = arith.mulf %67, %77 : vector<2x128xf32>
    %88 = arith.addf %86, %87 : vector<2x128xf32>
    %89 = math.tanh %88 : vector<2x128xf32>
    %90 = arith.mulf %85, %89 : vector<2x128xf32>
    %c2 = arith.constant 2 : index
    %c0_29 = arith.constant 0 : index
    %c0_30 = arith.constant 0 : index
    %91 = vector.load %arg0[%c2, %c0_29, %c0_30] : memref<9x2x1xf32, #tpu.memory_space<vmem>>, vector<1x2x1xf32>
    %92 = vector.shape_cast %91 : vector<1x2x1xf32> to vector<2x1xf32>
    %93 = vector.broadcast %92 : vector<2x1xf32> to vector<2x512xf32>
    %94 = vector.broadcast %1 : vector<1x512xf32> to vector<2x512xf32>
    %95 = arith.mulf %93, %94 : vector<2x512xf32>
    %96 = vector.broadcast %2 : vector<1x512xf32> to vector<2x512xf32>
    %97 = arith.addf %95, %96 : vector<2x512xf32>
    %cst_31 = arith.constant dense<0.000000e+00> : vector<2x512xf32>
    %98 = tpu.matmul %90, %0, %cst_31 {dimension_numbers = #tpu.dot_dimension_numbers<[1], [0], [0], [1], [0, 0, 1, 1], [], []>} : vector<2x128xf32>, vector<128x512xf32>, vector<2x512xf32> -> vector<2x512xf32>
    %99 = arith.addf %97, %98 : vector<2x512xf32>
    %100 = vector.extract_strided_slice %99 {offsets = [0, 0], sizes = [2, 128], strides = [1, 1]} : vector<2x512xf32> to vector<2x128xf32>
    %cst_32 = arith.constant 5.000000e-01 : f32
    %101 = vector.broadcast %cst_32 : f32 to vector<2x128xf32>
    %102 = arith.mulf %101, %100 : vector<2x128xf32>
    %103 = math.tanh %102 : vector<2x128xf32>
    %cst_33 = arith.constant 5.000000e-01 : f32
    %104 = vector.broadcast %cst_33 : f32 to vector<2x128xf32>
    %105 = arith.mulf %104, %103 : vector<2x128xf32>
    %cst_34 = arith.constant 5.000000e-01 : f32
    %106 = vector.broadcast %cst_34 : f32 to vector<2x128xf32>
    %107 = arith.addf %105, %106 : vector<2x128xf32>
    %108 = vector.extract_strided_slice %99 {offsets = [0, 128], sizes = [2, 128], strides = [1, 1]} : vector<2x512xf32> to vector<2x128xf32>
    %cst_35 = arith.constant 5.000000e-01 : f32
    %109 = vector.broadcast %cst_35 : f32 to vector<2x128xf32>
    %110 = arith.mulf %109, %108 : vector<2x128xf32>
    %111 = math.tanh %110 : vector<2x128xf32>
    %cst_36 = arith.constant 5.000000e-01 : f32
    %112 = vector.broadcast %cst_36 : f32 to vector<2x128xf32>
    %113 = arith.mulf %112, %111 : vector<2x128xf32>
    %cst_37 = arith.constant 5.000000e-01 : f32
    %114 = vector.broadcast %cst_37 : f32 to vector<2x128xf32>
    %115 = arith.addf %113, %114 : vector<2x128xf32>
    %116 = vector.extract_strided_slice %99 {offsets = [0, 256], sizes = [2, 128], strides = [1, 1]} : vector<2x512xf32> to vector<2x128xf32>
    %117 = math.tanh %116 : vector<2x128xf32>
    %118 = vector.extract_strided_slice %99 {offsets = [0, 384], sizes = [2, 128], strides = [1, 1]} : vector<2x512xf32> to vector<2x128xf32>
    %cst_38 = arith.constant 5.000000e-01 : f32
    %119 = vector.broadcast %cst_38 : f32 to vector<2x128xf32>
    %120 = arith.mulf %119, %118 : vector<2x128xf32>
    %121 = math.tanh %120 : vector<2x128xf32>
    %cst_39 = arith.constant 5.000000e-01 : f32
    %122 = vector.broadcast %cst_39 : f32 to vector<2x128xf32>
    %123 = arith.mulf %122, %121 : vector<2x128xf32>
    %cst_40 = arith.constant 5.000000e-01 : f32
    %124 = vector.broadcast %cst_40 : f32 to vector<2x128xf32>
    %125 = arith.addf %123, %124 : vector<2x128xf32>
    %126 = arith.mulf %115, %88 : vector<2x128xf32>
    %127 = arith.mulf %107, %117 : vector<2x128xf32>
    %128 = arith.addf %126, %127 : vector<2x128xf32>
    %129 = math.tanh %128 : vector<2x128xf32>
    %130 = arith.mulf %125, %129 : vector<2x128xf32>
    %c3 = arith.constant 3 : index
    %c0_41 = arith.constant 0 : index
    %c0_42 = arith.constant 0 : index
    %131 = vector.load %arg0[%c3, %c0_41, %c0_42] : memref<9x2x1xf32, #tpu.memory_space<vmem>>, vector<1x2x1xf32>
    %132 = vector.shape_cast %131 : vector<1x2x1xf32> to vector<2x1xf32>
    %133 = vector.broadcast %132 : vector<2x1xf32> to vector<2x512xf32>
    %134 = vector.broadcast %1 : vector<1x512xf32> to vector<2x512xf32>
    %135 = arith.mulf %133, %134 : vector<2x512xf32>
    %136 = vector.broadcast %2 : vector<1x512xf32> to vector<2x512xf32>
    %137 = arith.addf %135, %136 : vector<2x512xf32>
    %cst_43 = arith.constant dense<0.000000e+00> : vector<2x512xf32>
    %138 = tpu.matmul %130, %0, %cst_43 {dimension_numbers = #tpu.dot_dimension_numbers<[1], [0], [0], [1], [0, 0, 1, 1], [], []>} : vector<2x128xf32>, vector<128x512xf32>, vector<2x512xf32> -> vector<2x512xf32>
    %139 = arith.addf %137, %138 : vector<2x512xf32>
    %140 = vector.extract_strided_slice %139 {offsets = [0, 0], sizes = [2, 128], strides = [1, 1]} : vector<2x512xf32> to vector<2x128xf32>
    %cst_44 = arith.constant 5.000000e-01 : f32
    %141 = vector.broadcast %cst_44 : f32 to vector<2x128xf32>
    %142 = arith.mulf %141, %140 : vector<2x128xf32>
    %143 = math.tanh %142 : vector<2x128xf32>
    %cst_45 = arith.constant 5.000000e-01 : f32
    %144 = vector.broadcast %cst_45 : f32 to vector<2x128xf32>
    %145 = arith.mulf %144, %143 : vector<2x128xf32>
    %cst_46 = arith.constant 5.000000e-01 : f32
    %146 = vector.broadcast %cst_46 : f32 to vector<2x128xf32>
    %147 = arith.addf %145, %146 : vector<2x128xf32>
    %148 = vector.extract_strided_slice %139 {offsets = [0, 128], sizes = [2, 128], strides = [1, 1]} : vector<2x512xf32> to vector<2x128xf32>
    %cst_47 = arith.constant 5.000000e-01 : f32
    %149 = vector.broadcast %cst_47 : f32 to vector<2x128xf32>
    %150 = arith.mulf %149, %148 : vector<2x128xf32>
    %151 = math.tanh %150 : vector<2x128xf32>
    %cst_48 = arith.constant 5.000000e-01 : f32
    %152 = vector.broadcast %cst_48 : f32 to vector<2x128xf32>
    %153 = arith.mulf %152, %151 : vector<2x128xf32>
    %cst_49 = arith.constant 5.000000e-01 : f32
    %154 = vector.broadcast %cst_49 : f32 to vector<2x128xf32>
    %155 = arith.addf %153, %154 : vector<2x128xf32>
    %156 = vector.extract_strided_slice %139 {offsets = [0, 256], sizes = [2, 128], strides = [1, 1]} : vector<2x512xf32> to vector<2x128xf32>
    %157 = math.tanh %156 : vector<2x128xf32>
    %158 = vector.extract_strided_slice %139 {offsets = [0, 384], sizes = [2, 128], strides = [1, 1]} : vector<2x512xf32> to vector<2x128xf32>
    %cst_50 = arith.constant 5.000000e-01 : f32
    %159 = vector.broadcast %cst_50 : f32 to vector<2x128xf32>
    %160 = arith.mulf %159, %158 : vector<2x128xf32>
    %161 = math.tanh %160 : vector<2x128xf32>
    %cst_51 = arith.constant 5.000000e-01 : f32
    %162 = vector.broadcast %cst_51 : f32 to vector<2x128xf32>
    %163 = arith.mulf %162, %161 : vector<2x128xf32>
    %cst_52 = arith.constant 5.000000e-01 : f32
    %164 = vector.broadcast %cst_52 : f32 to vector<2x128xf32>
    %165 = arith.addf %163, %164 : vector<2x128xf32>
    %166 = arith.mulf %155, %128 : vector<2x128xf32>
    %167 = arith.mulf %147, %157 : vector<2x128xf32>
    %168 = arith.addf %166, %167 : vector<2x128xf32>
    %169 = math.tanh %168 : vector<2x128xf32>
    %170 = arith.mulf %165, %169 : vector<2x128xf32>
    %c4 = arith.constant 4 : index
    %c0_53 = arith.constant 0 : index
    %c0_54 = arith.constant 0 : index
    %171 = vector.load %arg0[%c4, %c0_53, %c0_54] : memref<9x2x1xf32, #tpu.memory_space<vmem>>, vector<1x2x1xf32>
    %172 = vector.shape_cast %171 : vector<1x2x1xf32> to vector<2x1xf32>
    %173 = vector.broadcast %172 : vector<2x1xf32> to vector<2x512xf32>
    %174 = vector.broadcast %1 : vector<1x512xf32> to vector<2x512xf32>
    %175 = arith.mulf %173, %174 : vector<2x512xf32>
    %176 = vector.broadcast %2 : vector<1x512xf32> to vector<2x512xf32>
    %177 = arith.addf %175, %176 : vector<2x512xf32>
    %cst_55 = arith.constant dense<0.000000e+00> : vector<2x512xf32>
    %178 = tpu.matmul %170, %0, %cst_55 {dimension_numbers = #tpu.dot_dimension_numbers<[1], [0], [0], [1], [0, 0, 1, 1], [], []>} : vector<2x128xf32>, vector<128x512xf32>, vector<2x512xf32> -> vector<2x512xf32>
    %179 = arith.addf %177, %178 : vector<2x512xf32>
    %180 = vector.extract_strided_slice %179 {offsets = [0, 0], sizes = [2, 128], strides = [1, 1]} : vector<2x512xf32> to vector<2x128xf32>
    %cst_56 = arith.constant 5.000000e-01 : f32
    %181 = vector.broadcast %cst_56 : f32 to vector<2x128xf32>
    %182 = arith.mulf %181, %180 : vector<2x128xf32>
    %183 = math.tanh %182 : vector<2x128xf32>
    %cst_57 = arith.constant 5.000000e-01 : f32
    %184 = vector.broadcast %cst_57 : f32 to vector<2x128xf32>
    %185 = arith.mulf %184, %183 : vector<2x128xf32>
    %cst_58 = arith.constant 5.000000e-01 : f32
    %186 = vector.broadcast %cst_58 : f32 to vector<2x128xf32>
    %187 = arith.addf %185, %186 : vector<2x128xf32>
    %188 = vector.extract_strided_slice %179 {offsets = [0, 128], sizes = [2, 128], strides = [1, 1]} : vector<2x512xf32> to vector<2x128xf32>
    %cst_59 = arith.constant 5.000000e-01 : f32
    %189 = vector.broadcast %cst_59 : f32 to vector<2x128xf32>
    %190 = arith.mulf %189, %188 : vector<2x128xf32>
    %191 = math.tanh %190 : vector<2x128xf32>
    %cst_60 = arith.constant 5.000000e-01 : f32
    %192 = vector.broadcast %cst_60 : f32 to vector<2x128xf32>
    %193 = arith.mulf %192, %191 : vector<2x128xf32>
    %cst_61 = arith.constant 5.000000e-01 : f32
    %194 = vector.broadcast %cst_61 : f32 to vector<2x128xf32>
    %195 = arith.addf %193, %194 : vector<2x128xf32>
    %196 = vector.extract_strided_slice %179 {offsets = [0, 256], sizes = [2, 128], strides = [1, 1]} : vector<2x512xf32> to vector<2x128xf32>
    %197 = math.tanh %196 : vector<2x128xf32>
    %198 = vector.extract_strided_slice %179 {offsets = [0, 384], sizes = [2, 128], strides = [1, 1]} : vector<2x512xf32> to vector<2x128xf32>
    %cst_62 = arith.constant 5.000000e-01 : f32
    %199 = vector.broadcast %cst_62 : f32 to vector<2x128xf32>
    %200 = arith.mulf %199, %198 : vector<2x128xf32>
    %201 = math.tanh %200 : vector<2x128xf32>
    %cst_63 = arith.constant 5.000000e-01 : f32
    %202 = vector.broadcast %cst_63 : f32 to vector<2x128xf32>
    %203 = arith.mulf %202, %201 : vector<2x128xf32>
    %cst_64 = arith.constant 5.000000e-01 : f32
    %204 = vector.broadcast %cst_64 : f32 to vector<2x128xf32>
    %205 = arith.addf %203, %204 : vector<2x128xf32>
    %206 = arith.mulf %195, %168 : vector<2x128xf32>
    %207 = arith.mulf %187, %197 : vector<2x128xf32>
    %208 = arith.addf %206, %207 : vector<2x128xf32>
    %209 = math.tanh %208 : vector<2x128xf32>
    %210 = arith.mulf %205, %209 : vector<2x128xf32>
    %c5 = arith.constant 5 : index
    %c0_65 = arith.constant 0 : index
    %c0_66 = arith.constant 0 : index
    %211 = vector.load %arg0[%c5, %c0_65, %c0_66] : memref<9x2x1xf32, #tpu.memory_space<vmem>>, vector<1x2x1xf32>
    %212 = vector.shape_cast %211 : vector<1x2x1xf32> to vector<2x1xf32>
    %213 = vector.broadcast %212 : vector<2x1xf32> to vector<2x512xf32>
    %214 = vector.broadcast %1 : vector<1x512xf32> to vector<2x512xf32>
    %215 = arith.mulf %213, %214 : vector<2x512xf32>
    %216 = vector.broadcast %2 : vector<1x512xf32> to vector<2x512xf32>
    %217 = arith.addf %215, %216 : vector<2x512xf32>
    %cst_67 = arith.constant dense<0.000000e+00> : vector<2x512xf32>
    %218 = tpu.matmul %210, %0, %cst_67 {dimension_numbers = #tpu.dot_dimension_numbers<[1], [0], [0], [1], [0, 0, 1, 1], [], []>} : vector<2x128xf32>, vector<128x512xf32>, vector<2x512xf32> -> vector<2x512xf32>
    %219 = arith.addf %217, %218 : vector<2x512xf32>
    %220 = vector.extract_strided_slice %219 {offsets = [0, 0], sizes = [2, 128], strides = [1, 1]} : vector<2x512xf32> to vector<2x128xf32>
    %cst_68 = arith.constant 5.000000e-01 : f32
    %221 = vector.broadcast %cst_68 : f32 to vector<2x128xf32>
    %222 = arith.mulf %221, %220 : vector<2x128xf32>
    %223 = math.tanh %222 : vector<2x128xf32>
    %cst_69 = arith.constant 5.000000e-01 : f32
    %224 = vector.broadcast %cst_69 : f32 to vector<2x128xf32>
    %225 = arith.mulf %224, %223 : vector<2x128xf32>
    %cst_70 = arith.constant 5.000000e-01 : f32
    %226 = vector.broadcast %cst_70 : f32 to vector<2x128xf32>
    %227 = arith.addf %225, %226 : vector<2x128xf32>
    %228 = vector.extract_strided_slice %219 {offsets = [0, 128], sizes = [2, 128], strides = [1, 1]} : vector<2x512xf32> to vector<2x128xf32>
    %cst_71 = arith.constant 5.000000e-01 : f32
    %229 = vector.broadcast %cst_71 : f32 to vector<2x128xf32>
    %230 = arith.mulf %229, %228 : vector<2x128xf32>
    %231 = math.tanh %230 : vector<2x128xf32>
    %cst_72 = arith.constant 5.000000e-01 : f32
    %232 = vector.broadcast %cst_72 : f32 to vector<2x128xf32>
    %233 = arith.mulf %232, %231 : vector<2x128xf32>
    %cst_73 = arith.constant 5.000000e-01 : f32
    %234 = vector.broadcast %cst_73 : f32 to vector<2x128xf32>
    %235 = arith.addf %233, %234 : vector<2x128xf32>
    %236 = vector.extract_strided_slice %219 {offsets = [0, 256], sizes = [2, 128], strides = [1, 1]} : vector<2x512xf32> to vector<2x128xf32>
    %237 = math.tanh %236 : vector<2x128xf32>
    %238 = vector.extract_strided_slice %219 {offsets = [0, 384], sizes = [2, 128], strides = [1, 1]} : vector<2x512xf32> to vector<2x128xf32>
    %cst_74 = arith.constant 5.000000e-01 : f32
    %239 = vector.broadcast %cst_74 : f32 to vector<2x128xf32>
    %240 = arith.mulf %239, %238 : vector<2x128xf32>
    %241 = math.tanh %240 : vector<2x128xf32>
    %cst_75 = arith.constant 5.000000e-01 : f32
    %242 = vector.broadcast %cst_75 : f32 to vector<2x128xf32>
    %243 = arith.mulf %242, %241 : vector<2x128xf32>
    %cst_76 = arith.constant 5.000000e-01 : f32
    %244 = vector.broadcast %cst_76 : f32 to vector<2x128xf32>
    %245 = arith.addf %243, %244 : vector<2x128xf32>
    %246 = arith.mulf %235, %208 : vector<2x128xf32>
    %247 = arith.mulf %227, %237 : vector<2x128xf32>
    %248 = arith.addf %246, %247 : vector<2x128xf32>
    %249 = math.tanh %248 : vector<2x128xf32>
    %250 = arith.mulf %245, %249 : vector<2x128xf32>
    %c6 = arith.constant 6 : index
    %c0_77 = arith.constant 0 : index
    %c0_78 = arith.constant 0 : index
    %251 = vector.load %arg0[%c6, %c0_77, %c0_78] : memref<9x2x1xf32, #tpu.memory_space<vmem>>, vector<1x2x1xf32>
    %252 = vector.shape_cast %251 : vector<1x2x1xf32> to vector<2x1xf32>
    %253 = vector.broadcast %252 : vector<2x1xf32> to vector<2x512xf32>
    %254 = vector.broadcast %1 : vector<1x512xf32> to vector<2x512xf32>
    %255 = arith.mulf %253, %254 : vector<2x512xf32>
    %256 = vector.broadcast %2 : vector<1x512xf32> to vector<2x512xf32>
    %257 = arith.addf %255, %256 : vector<2x512xf32>
    %cst_79 = arith.constant dense<0.000000e+00> : vector<2x512xf32>
    %258 = tpu.matmul %250, %0, %cst_79 {dimension_numbers = #tpu.dot_dimension_numbers<[1], [0], [0], [1], [0, 0, 1, 1], [], []>} : vector<2x128xf32>, vector<128x512xf32>, vector<2x512xf32> -> vector<2x512xf32>
    %259 = arith.addf %257, %258 : vector<2x512xf32>
    %260 = vector.extract_strided_slice %259 {offsets = [0, 0], sizes = [2, 128], strides = [1, 1]} : vector<2x512xf32> to vector<2x128xf32>
    %cst_80 = arith.constant 5.000000e-01 : f32
    %261 = vector.broadcast %cst_80 : f32 to vector<2x128xf32>
    %262 = arith.mulf %261, %260 : vector<2x128xf32>
    %263 = math.tanh %262 : vector<2x128xf32>
    %cst_81 = arith.constant 5.000000e-01 : f32
    %264 = vector.broadcast %cst_81 : f32 to vector<2x128xf32>
    %265 = arith.mulf %264, %263 : vector<2x128xf32>
    %cst_82 = arith.constant 5.000000e-01 : f32
    %266 = vector.broadcast %cst_82 : f32 to vector<2x128xf32>
    %267 = arith.addf %265, %266 : vector<2x128xf32>
    %268 = vector.extract_strided_slice %259 {offsets = [0, 128], sizes = [2, 128], strides = [1, 1]} : vector<2x512xf32> to vector<2x128xf32>
    %cst_83 = arith.constant 5.000000e-01 : f32
    %269 = vector.broadcast %cst_83 : f32 to vector<2x128xf32>
    %270 = arith.mulf %269, %268 : vector<2x128xf32>
    %271 = math.tanh %270 : vector<2x128xf32>
    %cst_84 = arith.constant 5.000000e-01 : f32
    %272 = vector.broadcast %cst_84 : f32 to vector<2x128xf32>
    %273 = arith.mulf %272, %271 : vector<2x128xf32>
    %cst_85 = arith.constant 5.000000e-01 : f32
    %274 = vector.broadcast %cst_85 : f32 to vector<2x128xf32>
    %275 = arith.addf %273, %274 : vector<2x128xf32>
    %276 = vector.extract_strided_slice %259 {offsets = [0, 256], sizes = [2, 128], strides = [1, 1]} : vector<2x512xf32> to vector<2x128xf32>
    %277 = math.tanh %276 : vector<2x128xf32>
    %278 = vector.extract_strided_slice %259 {offsets = [0, 384], sizes = [2, 128], strides = [1, 1]} : vector<2x512xf32> to vector<2x128xf32>
    %cst_86 = arith.constant 5.000000e-01 : f32
    %279 = vector.broadcast %cst_86 : f32 to vector<2x128xf32>
    %280 = arith.mulf %279, %278 : vector<2x128xf32>
    %281 = math.tanh %280 : vector<2x128xf32>
    %cst_87 = arith.constant 5.000000e-01 : f32
    %282 = vector.broadcast %cst_87 : f32 to vector<2x128xf32>
    %283 = arith.mulf %282, %281 : vector<2x128xf32>
    %cst_88 = arith.constant 5.000000e-01 : f32
    %284 = vector.broadcast %cst_88 : f32 to vector<2x128xf32>
    %285 = arith.addf %283, %284 : vector<2x128xf32>
    %286 = arith.mulf %275, %248 : vector<2x128xf32>
    %287 = arith.mulf %267, %277 : vector<2x128xf32>
    %288 = arith.addf %286, %287 : vector<2x128xf32>
    %289 = math.tanh %288 : vector<2x128xf32>
    %290 = arith.mulf %285, %289 : vector<2x128xf32>
    %c7 = arith.constant 7 : index
    %c0_89 = arith.constant 0 : index
    %c0_90 = arith.constant 0 : index
    %291 = vector.load %arg0[%c7, %c0_89, %c0_90] : memref<9x2x1xf32, #tpu.memory_space<vmem>>, vector<1x2x1xf32>
    %292 = vector.shape_cast %291 : vector<1x2x1xf32> to vector<2x1xf32>
    %293 = vector.broadcast %292 : vector<2x1xf32> to vector<2x512xf32>
    %294 = vector.broadcast %1 : vector<1x512xf32> to vector<2x512xf32>
    %295 = arith.mulf %293, %294 : vector<2x512xf32>
    %296 = vector.broadcast %2 : vector<1x512xf32> to vector<2x512xf32>
    %297 = arith.addf %295, %296 : vector<2x512xf32>
    %cst_91 = arith.constant dense<0.000000e+00> : vector<2x512xf32>
    %298 = tpu.matmul %290, %0, %cst_91 {dimension_numbers = #tpu.dot_dimension_numbers<[1], [0], [0], [1], [0, 0, 1, 1], [], []>} : vector<2x128xf32>, vector<128x512xf32>, vector<2x512xf32> -> vector<2x512xf32>
    %299 = arith.addf %297, %298 : vector<2x512xf32>
    %300 = vector.extract_strided_slice %299 {offsets = [0, 0], sizes = [2, 128], strides = [1, 1]} : vector<2x512xf32> to vector<2x128xf32>
    %cst_92 = arith.constant 5.000000e-01 : f32
    %301 = vector.broadcast %cst_92 : f32 to vector<2x128xf32>
    %302 = arith.mulf %301, %300 : vector<2x128xf32>
    %303 = math.tanh %302 : vector<2x128xf32>
    %cst_93 = arith.constant 5.000000e-01 : f32
    %304 = vector.broadcast %cst_93 : f32 to vector<2x128xf32>
    %305 = arith.mulf %304, %303 : vector<2x128xf32>
    %cst_94 = arith.constant 5.000000e-01 : f32
    %306 = vector.broadcast %cst_94 : f32 to vector<2x128xf32>
    %307 = arith.addf %305, %306 : vector<2x128xf32>
    %308 = vector.extract_strided_slice %299 {offsets = [0, 128], sizes = [2, 128], strides = [1, 1]} : vector<2x512xf32> to vector<2x128xf32>
    %cst_95 = arith.constant 5.000000e-01 : f32
    %309 = vector.broadcast %cst_95 : f32 to vector<2x128xf32>
    %310 = arith.mulf %309, %308 : vector<2x128xf32>
    %311 = math.tanh %310 : vector<2x128xf32>
    %cst_96 = arith.constant 5.000000e-01 : f32
    %312 = vector.broadcast %cst_96 : f32 to vector<2x128xf32>
    %313 = arith.mulf %312, %311 : vector<2x128xf32>
    %cst_97 = arith.constant 5.000000e-01 : f32
    %314 = vector.broadcast %cst_97 : f32 to vector<2x128xf32>
    %315 = arith.addf %313, %314 : vector<2x128xf32>
    %316 = vector.extract_strided_slice %299 {offsets = [0, 256], sizes = [2, 128], strides = [1, 1]} : vector<2x512xf32> to vector<2x128xf32>
    %317 = math.tanh %316 : vector<2x128xf32>
    %318 = vector.extract_strided_slice %299 {offsets = [0, 384], sizes = [2, 128], strides = [1, 1]} : vector<2x512xf32> to vector<2x128xf32>
    %cst_98 = arith.constant 5.000000e-01 : f32
    %319 = vector.broadcast %cst_98 : f32 to vector<2x128xf32>
    %320 = arith.mulf %319, %318 : vector<2x128xf32>
    %321 = math.tanh %320 : vector<2x128xf32>
    %cst_99 = arith.constant 5.000000e-01 : f32
    %322 = vector.broadcast %cst_99 : f32 to vector<2x128xf32>
    %323 = arith.mulf %322, %321 : vector<2x128xf32>
    %cst_100 = arith.constant 5.000000e-01 : f32
    %324 = vector.broadcast %cst_100 : f32 to vector<2x128xf32>
    %325 = arith.addf %323, %324 : vector<2x128xf32>
    %326 = arith.mulf %315, %288 : vector<2x128xf32>
    %327 = arith.mulf %307, %317 : vector<2x128xf32>
    %328 = arith.addf %326, %327 : vector<2x128xf32>
    %329 = math.tanh %328 : vector<2x128xf32>
    %330 = arith.mulf %325, %329 : vector<2x128xf32>
    %c8 = arith.constant 8 : index
    %c0_101 = arith.constant 0 : index
    %c0_102 = arith.constant 0 : index
    %331 = vector.load %arg0[%c8, %c0_101, %c0_102] : memref<9x2x1xf32, #tpu.memory_space<vmem>>, vector<1x2x1xf32>
    %332 = vector.shape_cast %331 : vector<1x2x1xf32> to vector<2x1xf32>
    %333 = vector.broadcast %332 : vector<2x1xf32> to vector<2x512xf32>
    %334 = vector.broadcast %1 : vector<1x512xf32> to vector<2x512xf32>
    %335 = arith.mulf %333, %334 : vector<2x512xf32>
    %336 = vector.broadcast %2 : vector<1x512xf32> to vector<2x512xf32>
    %337 = arith.addf %335, %336 : vector<2x512xf32>
    %cst_103 = arith.constant dense<0.000000e+00> : vector<2x512xf32>
    %338 = tpu.matmul %330, %0, %cst_103 {dimension_numbers = #tpu.dot_dimension_numbers<[1], [0], [0], [1], [0, 0, 1, 1], [], []>} : vector<2x128xf32>, vector<128x512xf32>, vector<2x512xf32> -> vector<2x512xf32>
    %339 = arith.addf %337, %338 : vector<2x512xf32>
    %340 = vector.extract_strided_slice %339 {offsets = [0, 0], sizes = [2, 128], strides = [1, 1]} : vector<2x512xf32> to vector<2x128xf32>
    %cst_104 = arith.constant 5.000000e-01 : f32
    %341 = vector.broadcast %cst_104 : f32 to vector<2x128xf32>
    %342 = arith.mulf %341, %340 : vector<2x128xf32>
    %343 = math.tanh %342 : vector<2x128xf32>
    %cst_105 = arith.constant 5.000000e-01 : f32
    %344 = vector.broadcast %cst_105 : f32 to vector<2x128xf32>
    %345 = arith.mulf %344, %343 : vector<2x128xf32>
    %cst_106 = arith.constant 5.000000e-01 : f32
    %346 = vector.broadcast %cst_106 : f32 to vector<2x128xf32>
    %347 = arith.addf %345, %346 : vector<2x128xf32>
    %348 = vector.extract_strided_slice %339 {offsets = [0, 128], sizes = [2, 128], strides = [1, 1]} : vector<2x512xf32> to vector<2x128xf32>
    %cst_107 = arith.constant 5.000000e-01 : f32
    %349 = vector.broadcast %cst_107 : f32 to vector<2x128xf32>
    %350 = arith.mulf %349, %348 : vector<2x128xf32>
    %351 = math.tanh %350 : vector<2x128xf32>
    %cst_108 = arith.constant 5.000000e-01 : f32
    %352 = vector.broadcast %cst_108 : f32 to vector<2x128xf32>
    %353 = arith.mulf %352, %351 : vector<2x128xf32>
    %cst_109 = arith.constant 5.000000e-01 : f32
    %354 = vector.broadcast %cst_109 : f32 to vector<2x128xf32>
    %355 = arith.addf %353, %354 : vector<2x128xf32>
    %356 = vector.extract_strided_slice %339 {offsets = [0, 256], sizes = [2, 128], strides = [1, 1]} : vector<2x512xf32> to vector<2x128xf32>
    %357 = math.tanh %356 : vector<2x128xf32>
    %358 = vector.extract_strided_slice %339 {offsets = [0, 384], sizes = [2, 128], strides = [1, 1]} : vector<2x512xf32> to vector<2x128xf32>
    %cst_110 = arith.constant 5.000000e-01 : f32
    %359 = vector.broadcast %cst_110 : f32 to vector<2x128xf32>
    %360 = arith.mulf %359, %358 : vector<2x128xf32>
    %361 = math.tanh %360 : vector<2x128xf32>
    %cst_111 = arith.constant 5.000000e-01 : f32
    %362 = vector.broadcast %cst_111 : f32 to vector<2x128xf32>
    %363 = arith.mulf %362, %361 : vector<2x128xf32>
    %cst_112 = arith.constant 5.000000e-01 : f32
    %364 = vector.broadcast %cst_112 : f32 to vector<2x128xf32>
    %365 = arith.addf %363, %364 : vector<2x128xf32>
    %366 = arith.mulf %355, %328 : vector<2x128xf32>
    %367 = arith.mulf %347, %357 : vector<2x128xf32>
    %368 = arith.addf %366, %367 : vector<2x128xf32>
    %369 = math.tanh %368 : vector<2x128xf32>
    %370 = arith.mulf %365, %369 : vector<2x128xf32>
    %c0_113 = arith.constant 0 : index
    %c0_114 = arith.constant 0 : index
    %371 = vector.load %arg4[%c0_113, %c0_114] : memref<1x128xf32, #tpu.memory_space<vmem>>, vector<1x128xf32>
    %372 = vector.broadcast %371 : vector<1x128xf32> to vector<2x128xf32>
    %373 = arith.mulf %370, %372 : vector<2x128xf32>
    %cst_115 = arith.constant dense<0.000000e+00> : vector<2xf32>
    %374 = vector.multi_reduction <add>, %373, %cst_115 [1] : vector<2x128xf32> to vector<2xf32>
    %375 = vector.shape_cast %374 : vector<2xf32> to vector<2x1xf32>
    %c0_116 = arith.constant 0 : index
    %c0_117 = arith.constant 0 : index
    %376 = vector.load %arg5[%c0_116, %c0_117] : memref<1x1xf32, #tpu.memory_space<vmem>>, vector<1x1xf32>
    %377 = vector.broadcast %376 : vector<1x1xf32> to vector<2x1xf32>
    %378 = arith.addf %375, %377 : vector<2x1xf32>
    %c0_118 = arith.constant 0 : index
    %c0_119 = arith.constant 0 : index
    %379 = vector.load %arg6[%c0_118, %c0_119] : memref<2x1xf32, #tpu.memory_space<vmem>>, vector<2x1xf32>
    tpu.vector_store %arg6[%c0_118, %c0_119], %378 {strides = array<i32>} : memref<2x1xf32, #tpu.memory_space<vmem>>, vector<2x1xf32>,
    return
  }
}

</mosaic_0001>

<bundles_post_ra>
// kernel: lstm_forward.1
= control target key start
LH: loop header
LB: loop body
LE: loop exit
PB: predicated region body
PF: predicated region fallthrough
CT: control target
= control target key end

     0   :  { %v2247_v0 = vmov 0   ;;  %v2248_v46 = vmov 0.0   ;;  %vm1612_vm1 = vcmask 1041408   ;;  %vm1624_vm2 = vcmask 1024   ;;  %s2970_s0 = inlined_call_operand.vmem [shape: f32[9,2,1], index: 0, kind: input, shape index: {}]   ;;  %s2971_s3 = inlined_call_operand.vmem [shape: f32[128,512], index: 3, kind: input, shape index: {}]   ;;  %s2972_s1 = inlined_call_operand.vmem [shape: f32[1,512], index: 1, kind: input, shape index: {}]   ;;  %s2973_s2 = inlined_call_operand.vmem [shape: f32[1,512], index: 2, kind: input, shape index: {}]   ;;  %s2974_s5 = inlined_call_operand.<no memory space> [shape: f32[1,1], index: 5, kind: input, shape index: {}]   ;;  %s2975_s4 = inlined_call_operand.vmem [shape: f32[1,128], index: 4, kind: input, shape index: {}]   ;;  %s2976_s6 = inlined_call_operand.vmem [shape: f32[2,1], index: 6, kind: output, shape index: {}]  }
   0x1   :  { %2155 = vset.pattern.permute.xlu0 %v2247_v0  ;;  %v96_v1 = vld [vmem:[%s2970_s0] sm:$0x3]  ;;  %2156 = vset.pattern.permute.xlu1 %v2247_v0  ;;  %v1631_v2 = vld [vmem:[%s2970_s0 + $0x2] sm:$0x3]  ;;  %v1634_v3 = vld [vmem:[%s2970_s0 + $0x8] sm:$0x3] }
   0x2   :  { %99 = vperm.xlu0 %2155, %v96_v1   ;;  %v26_v4 = vld [vmem:[%s2971_s3 + $0x8] sm:$0xff]  ;;  %v28_v6 = vld [vmem:[%s2971_s3 + $0x18] sm:$0xff]  ;;  %v25_v9 = vld [vmem:[%s2971_s3] sm:$0xff]  ;;  %251 = vmatprep.mubr.f32.mxu0 %v2248_v46 }
   0x3   :  { %v30_v5 = vld [vmem:[%s2971_s3 + $0x28] sm:$0xff]  ;;  %v32_v8 = vld [vmem:[%s2971_s3 + $0x38] sm:$0xff]  ;;  %v29_v10 = vld [vmem:[%s2971_s3 + $0x20] sm:$0xff]  ;;  %322 = vmatprep.mubr.f32.mxu1 %v2248_v46 }
   0x4   :  { %v2302_v7 = vpack.c.bf16 %v30_v5, %v26_v4  ;;  %v1636_v11 = vld [vmem:[%s2970_s0 + $0xc] sm:$0x3]  ;;  %v2316_v12 = vpack.c.bf16 %v32_v8, %v28_v6  ;;  %v2318_v13 = vpack.c.bf16 %v29_v10, %v25_v9  ;;  %v27_v14 = vld [vmem:[%s2971_s3 + $0x10] sm:$0xff]  ;;  %v36_v19 = vld [vmem:[%s2971_s3 + $0x58] sm:$0xff] }
   0x5   :  { %v31_v15 = vld [vmem:[%s2971_s3 + $0x30] sm:$0xff]  ;;  %v34_v17 = vld [vmem:[%s2971_s3 + $0x48] sm:$0xff]  ;;  %v40_v21 = vld [vmem:[%s2971_s3 + $0x78] sm:$0xff] }
   0x6   :  { %176 = vperm.xlu0 %2155, %v1631_v2   ;;  %1642 = vmatprep.subr.bf16.mxu0 %v2302_v7  ;;  %v2327_v16 = vpack.c.bf16 %v31_v15, %v27_v14  ;;  %v38_v18 = vld [vmem:[%s2971_s3 + $0x68] sm:$0xff]  ;;  %v33_v22 = vld [vmem:[%s2971_s3 + $0x40] sm:$0xff]  ;;  %v1638_v24 = vld [vmem:[%s2970_s0 + $0x10] sm:$0x3]  ;;  %v2355_v25 = vpack.c.bf16 %v40_v21, %v36_v19 }
   0x7   :  { %1674 = vmatprep.subr.bf16.mxu1 %v2316_v12  ;;  %1644 = vmatpush1.bf16.msra.mxu0 %v2318_v13  ;;  %v2341_v20 = vpack.c.bf16 %v38_v18, %v34_v17  ;;  %v37_v23 = vld [vmem:[%s2971_s3 + $0x60] sm:$0xff]  ;;  %v35_v27 = vld [vmem:[%s2971_s3 + $0x50] sm:$0xff]  ;;  %v42_v30 = vld [vmem:[%s2971_s3 + $0x88] sm:$0xff] }
   0x8   :  { %1676 = vmatpush1.bf16.msra.mxu1 %v2327_v16  ;;  %v2357_v26 = vpack.c.bf16 %v37_v23, %v33_v22  ;;  %v39_v28 = vld [vmem:[%s2971_s3 + $0x70] sm:$0xff]  ;;  %v46_v31 = vld [vmem:[%s2971_s3 + $0xa8] sm:$0xff]  ;;  %v44_v32 = vld [vmem:[%s2971_s3 + $0x98] sm:$0xff] }
   0x9   :  { %1646 = vmatprep.subr.bf16.mxu0 %v2341_v20  ;;  %v2366_v29 = vpack.c.bf16 %v39_v28, %v35_v27  ;;  %1678 = vmatprep.subr.bf16.mxu1 %v2355_v25  ;;  %v2380_v33 = vpack.c.bf16 %v46_v31, %v42_v30  ;;  %v48_v34 = vld [vmem:[%s2971_s3 + $0xb8] sm:$0xff]  ;;  %v41_v35 = vld [vmem:[%s2971_s3 + $0x80] sm:$0xff]  ;;  %v43_v39 = vld [vmem:[%s2971_s3 + $0x90] sm:$0xff] }
   0xa   :  { %713 = vperm.xlu0 %2155, %v1634_v3   ;;  %v45_v36 = vld [vmem:[%s2971_s3 + $0xa0] sm:$0xff]  ;;  %v2391_v37 = vpack.c.bf16 %v48_v34, %v44_v32  ;;  %v47_v40 = vld [vmem:[%s2971_s3 + $0xb0] sm:$0xff]  ;;  %v50_v41 = vld [vmem:[%s2971_s3 + $0xc8] sm:$0xff] }
   0xb   :  { %1648 = vmatpush1.bf16.msra.mxu0 %v2357_v26  ;;  %v2393_v38 = vpack.c.bf16 %v45_v36, %v41_v35  ;;  %v2405_v42 = vpack.c.bf16 %v47_v40, %v43_v39  ;;  %v54_v43 = vld [vmem:[%s2971_s3 + $0xe8] sm:$0xff]  ;;  %v52_v44 = vld [vmem:[%s2971_s3 + $0xd8] sm:$0xff]  ;;  %v49_v49 = vld [vmem:[%s2971_s3 + $0xc0] sm:$0xff] }
   0xc   :  { %1680 = vmatpush1.bf16.msra.mxu1 %v2366_v29  ;;  %1650 = vmatprep.subr.bf16.mxu0 %v2380_v33  ;;  %v56_v45 = vld [vmem:[%s2971_s3 + $0xf8] sm:$0xff]  ;;  %v2419_v47 = vpack.c.bf16 %v54_v43, %v50_v41  ;;  %v53_v50 = vld [vmem:[%s2971_s3 + $0xe0] sm:$0xff]  ;;  %v51_v51 = vld [vmem:[%s2971_s3 + $0xd0] sm:$0xff] }
   0xd   :  { %1682 = vmatprep.subr.bf16.mxu1 %v2391_v37  ;;  %v2421_v48 = vpack.c.bf16 %v56_v45, %v52_v44  ;;  %v2433_v52 = vpack.c.bf16 %v53_v50, %v49_v49  ;;  %v55_v53 = vld [vmem:[%s2971_s3 + $0xf0] sm:$0xff]  ;;  %v58_v54 = vld [vmem:[%s2971_s3 + $0x108] sm:$0xff]  ;;  %v60_v58 = vld [vmem:[%s2971_s3 + $0x118] sm:$0xff] }
   0xe   :  { %1071 = vperm.xlu0 %2155, %v1636_v11   ;;  %v62_v55 = vld [vmem:[%s2971_s3 + $0x128] sm:$0xff]  ;;  %v2447_v56 = vpack.c.bf16 %v55_v53, %v51_v51  ;;  %v64_v59 = vld [vmem:[%s2971_s3 + $0x138] sm:$0xff]  ;;  %v57_v60 = vld [vmem:[%s2971_s3 + $0x100] sm:$0xff] }
   0xf   :  { %1652 = vmatpush1.bf16.msra.mxu0 %v2393_v38  ;;  %v2449_v57 = vpack.c.bf16 %v62_v55, %v58_v54  ;;  %v2460_v61 = vpack.c.bf16 %v64_v59, %v60_v58  ;;  %v61_v62 = vld [vmem:[%s2971_s3 + $0x120] sm:$0xff]  ;;  %v59_v63 = vld [vmem:[%s2971_s3 + $0x110] sm:$0xff]  ;;  %v66_v2 = vld [vmem:[%s2971_s3 + $0x148] sm:$0xff]  ;;  %v91_v55 = vlaneseq }
  0x10   :  { %1684 = vmatpush1.bf16.msra.mxu1 %v2405_v42  ;;  %1654 = vmatprep.subr.bf16.mxu0 %v2419_v47  ;;  %v63_v0 = vld [vmem:[%s2971_s3 + $0x130] sm:$0xff]  ;;  %v2472_v1 = vpack.c.bf16 %v61_v62, %v57_v60  ;;  %v70_v3 = vld [vmem:[%s2971_s3 + $0x168] sm:$0xff]  ;;  %v68_v4 = vld [vmem:[%s2971_s3 + $0x158] sm:$0xff] }
  0x11   :  { %1686 = vmatprep.subr.bf16.mxu1 %v2421_v48  ;;  %v2485_v5 = vpack.c.bf16 %v63_v0, %v59_v63  ;;  %v2487_v6 = vpack.c.bf16 %v70_v3, %v66_v2  ;;  %v72_v8 = vld [vmem:[%s2971_s3 + $0x178] sm:$0xff]  ;;  %v65_v9 = vld [vmem:[%s2971_s3 + $0x140] sm:$0xff]  ;;  %v67_v14 = vld [vmem:[%s2971_s3 + $0x150] sm:$0xff]  ;;  %v104_v58 = vshrl.u32 %v91_v55, 7 }
  0x12   :  { %1429 = vperm.xlu0 %2155, %v1638_v24   ;;  %v69_v10 = vld [vmem:[%s2971_s3 + $0x160] sm:$0xff]  ;;  %v2499_v11 = vpack.c.bf16 %v72_v8, %v68_v4  ;;  %v71_v15 = vld [vmem:[%s2971_s3 + $0x170] sm:$0xff]  ;;  %v74_v17 = vld [vmem:[%s2971_s3 + $0x188] sm:$0xff] }
  0x13   :  { %1656 = vmatpush1.bf16.msra.mxu0 %v2433_v52  ;;  %v78_v18 = vld [vmem:[%s2971_s3 + $0x1a8] sm:$0xff]  ;;  %v76_v19 = vld [vmem:[%s2971_s3 + $0x198] sm:$0xff]  ;;  %v2520_v22 = vpack.c.bf16 %v69_v10, %v65_v9  ;;  %v2524_v23 = vpack.c.bf16 %v71_v15, %v67_v14  ;;  %v73_v27 = vld [vmem:[%s2971_s3 + $0x180] sm:$0xff]  ;;  %v105_v59 = vsub.s32 0, %v104_v58  ;;  %v109_v60 = vsub.s32 1, %v104_v58 }
  0x14   :  { %1688 = vmatpush1.bf16.msra.mxu1 %v2447_v56  ;;  %1658 = vmatprep.subr.bf16.mxu0 %v2449_v57  ;;  %v80_v21 = vld [vmem:[%s2971_s3 + $0x1b8] sm:$0xff]  ;;  %v2526_v24 = vpack.c.bf16 %v78_v18, %v74_v17  ;;  %v77_v28 = vld [vmem:[%s2971_s3 + $0x1a0] sm:$0xff]  ;;  %v75_v30 = vld [vmem:[%s2971_s3 + $0x190] sm:$0xff]  ;;  %v113_v63 = vsub.s32 2, %v104_v58  ;;  %v117_v4 = vsub.s32 3, %v104_v58 }
  0x15   :  { %1690 = vmatprep.subr.bf16.mxu1 %v2460_v61  ;;  %v2538_v31 = vpack.c.bf16 %v80_v21, %v76_v19  ;;  %v79_v32 = vld [vmem:[%s2971_s3 + $0x1b0] sm:$0xff]  ;;  %v82_v34 = vld [vmem:[%s2971_s3 + $0x1c8] sm:$0xff]  ;;  %v84_v36 = vld [vmem:[%s2971_s3 + $0x1d8] sm:$0xff]  ;;  %v2556_v40 = vpack.c.bf16 %v77_v28, %v73_v27 }
  0x16   :  { %v86_v35 = vld [vmem:[%s2971_s3 + $0x1e8] sm:$0xff]  ;;  %v88_v39 = vld [vmem:[%s2971_s3 + $0x1f8] sm:$0xff]  ;;  %v2560_v41 = vpack.c.bf16 %v79_v32, %v75_v30  ;;  %v81_v44 = vld [vmem:[%s2971_s3 + $0x1c0] sm:$0xff] }
  0x17   :  { %1660 = vmatpush1.bf16.msra.mxu0 %v2472_v1  ;;  %v2562_v43 = vpack.c.bf16 %v86_v35, %v82_v34  ;;  %v85_v45 = vld [vmem:[%s2971_s3 + $0x1e0] sm:$0xff]  ;;  %v2571_v49 = vpack.c.bf16 %v88_v39, %v84_v36  ;;  %v83_v50 = vld [vmem:[%s2971_s3 + $0x1d0] sm:$0xff] }
  0x18   :  { %1692 = vmatpush1.bf16.msra.mxu1 %v2485_v5  ;;  %1662 = vmatprep.subr.bf16.mxu0 %v2487_v6  ;;  %v87_v51 = vld [vmem:[%s2971_s3 + $0x1f0] sm:$0xff]  ;;  %v2580_v53 = vpack.c.bf16 %v85_v45, %v81_v44  ;;  %v89_v62 = vld [vmem:[%s2972_s1] sm:$0xf] }
  0x19   :  { %1694 = vmatprep.subr.bf16.mxu1 %v2499_v11  ;;  %v2584_v54 = vpack.c.bf16 %v87_v51, %v83_v50  ;;  %v90_v0 = vld [vmem:[%s2973_s2] sm:$0xf]  ;;  %v2597_v2 = vrot.slane %v89_v62, %v105_v59  ;;  %v2599_v3 = vrot.slane %v89_v62, %v109_v60  ;;  %v2601_v8 = vrot.slane %v89_v62, %v113_v63 }
  0x1a   :  { %v2603_v9 = vrot.slane %v90_v0, %v105_v59  ;;  %v2605_v10 = vrot.slane %v90_v0, %v109_v60  ;;  %v2609_v18 = vrot.slane %v89_v62, %v117_v4  ;;  %v2611_v19 = vrot.slane %v90_v0, %v113_v63 }
  0x1b   :  { %1664 = vmatpush1.bf16.msra.mxu0 %v2520_v22  ;;  %v2616_v34 = vrot.slane %v90_v0, %v117_v4  ;;  %v92_v50 = vand.u32 127, %v91_v55 }
  0x1c   :  { %1696 = vmatpush1.bf16.msra.mxu1 %v2524_v23  ;;  %1666 = vmatprep.subr.bf16.mxu0 %v2526_v24 }
  0x1d   :  { %1698 = vmatprep.subr.bf16.mxu1 %v2538_v31  ;;  %vm93_vm0 = vcmp.lt.s32.totalorder %v92_v50, 64 }
  0x1f   :  { %1668 = vmatpush1.bf16.msra.mxu0 %v2556_v40 }
  0x20   :  { %1700 = vmatpush1.bf16.msra.mxu1 %v2560_v41  ;;  %1670 = vmatprep.subr.bf16.mxu0 %v2562_v43 }
  0x21   :  { %1702 = vmatprep.subr.bf16.mxu1 %v2571_v49 }
  0x23   :  { %1672 = vmatpush1.bf16.msra.mxu0 %v2580_v53 }
  0x24   :  { %1704 = vmatpush1.bf16.msra.mxu1 %v2584_v54  ;;  %1706 = vmatprep.subr.bf16.mxu0 %v2302_v7 }
  0x25   :  { %1738 = vmatprep.subr.bf16.mxu1 %v2316_v12 }
  0x81   :  { %v100_v14 = vpop.permute.xlu0 %99 }
  0x82   :  { %v123_v15 = vmul.f32 %v2597_v2, %v100_v14  ;;  %v124_v17 = vmul.f32 %v2599_v3, %v100_v14  ;;  %v125_v21 = vmul.f32 %v2601_v8, %v100_v14  ;;  %v126_v35 = vmul.f32 %v2609_v18, %v100_v14 }
  0x83   :  { %v1630_v14 = vsel %vm93_vm0, 1.0, %v2248_v46 }
  0x84   :  { %v148_v27 = vadd.f32 %v2603_v9, %v123_v15  ;;  %v149_v28 = vadd.f32 %v2605_v10, %v124_v17  ;;  %v150_v36 = vadd.f32 %v2611_v19, %v125_v21  ;;  %v151_v39 = vadd.f32 %v2616_v34, %v126_v35  ;;  %v1632_v35 = vld [vmem:[%s2970_s0 + $0x4] sm:$0x3] }
  0x85   :  { %355 = vperm.xlu1 %2156, %v1632_v35  }
  0x86   :  { %v152_v30 = vmul.f32 0.5, %v148_v27  ;;  %v156_v32 = vmul.f32 0.5, %v149_v28  ;;  %v161_v44 = vmul.f32 0.5, %v151_v39  ;;  %v1635_v39 = vld [vmem:[%s2970_s0 + $0xa] sm:$0x3] }
  0x88   :  { %2157 = vtanh.f32 %v152_v30 }
  0x89   :  { %2159 = vtanh.f32 %v156_v32 }
  0x8a   :  { %2161 = vtanh.f32 %v150_v36  ;;  %v1633_v36 = vld [vmem:[%s2970_s0 + $0x6] sm:$0x3] }
  0x8b   :  { %2163 = vtanh.f32 %v161_v44  ;;  %534 = vperm.xlu1 %2156, %v1633_v36   ;;  %v1637_v44 = vld [vmem:[%s2970_s0 + $0xe] sm:$0x3] }
  0x8f   :  { %892 = vperm.xlu1 %2156, %v1635_v39  }
  0x92   :  { %v2158_v45 = vpop.eup %2157 }
  0x93   :  { %v2160_v51 = vpop.eup %2159  ;;  %v154_v58 = vmul.f32 0.5, %v2158_v45  ;;  %1250 = vperm.xlu1 %2156, %v1637_v44   ;;  %v177_v45 = vpop.permute.xlu0 %176 }
  0x94   :  { %v158_v59 = vmul.f32 0.5, %v2160_v51  ;;  %v2162_v62 = vpop.eup %2161  ;;  %v179_v50 = vmul.f32 %v177_v45, %v2597_v2  ;;  %v180_v51 = vmul.f32 %v177_v45, %v2599_v3 }
  0x95   :  { %v155_v60 = vadd.f32 0.5, %v154_v58  ;;  %v2164_v21 = vpop.eup %2163 }
  0x96   :  { %v159_v63 = vadd.f32 0.5, %v158_v59  ;;  %v163_v27 = vmul.f32 0.5, %v2164_v21  ;;  %v183_v58 = vadd.f32 %v179_v50, %v2603_v9  ;;  %v181_v59 = vmul.f32 %v177_v45, %v2601_v8 }
  0x97   :  { %v166_v0 = vmul.f32 %v2162_v62, %v155_v60 }
  0x98   :  { %v165_v4 = vmul.f32 0.0, %v159_v63  ;;  %v164_v28 = vadd.f32 0.5, %v163_v27  ;;  %v184_v63 = vadd.f32 %v180_v51, %v2605_v10  ;;  %v185_v27 = vadd.f32 %v181_v59, %v2611_v19 }
  0x9a   :  { %v167_v15 = vadd.f32 %v166_v0, %v165_v4 }
  0x9c   :  { %2165 = vtanh.f32 %v167_v15  ;;  %v2622_v17 = vmul.f32 %v1630_v14, %v167_v15 }
  0xa6   :  { %v2166_v55 = vpop.eup %2165 }
  0xa7   :  { %v169_v30 = vmul.f32 %v2166_v55, %v164_v28  ;;  %v182_v28 = vmul.f32 %v177_v45, %v2609_v18 }
  0xa9   :  { %v170_v32 = vmul.f32 %v1630_v14, %v169_v30 }
  0xab   :  { %252 = vmatmul.mubr.f32.vlgmr.msra.gmra.mrb[0].mxu0 %v170_v32  ;;  %323 = vmatmul.mubr.f32.vlgmr.msra.gmra.mrb[0].mxu1 %v170_v32  ;;  %v186_v32 = vadd.f32 %v182_v28, %v2616_v34 }
  0xac   :  { %1708 = vmatpush1.bf16.msra.mxu0 %v2318_v13  ;;  %1740 = vmatpush1.bf16.msra.mxu1 %v2327_v16 }
  0xad   :  { %1710 = vmatprep.subr.bf16.mxu0 %v2341_v20  ;;  %1742 = vmatprep.subr.bf16.mxu1 %v2355_v25 }
  0xae   :  { %430 = vmatprep.mubr.f32.mxu0 %v2248_v46  ;;  %501 = vmatprep.mubr.f32.mxu1 %v2248_v46 }
  0xb0   :  { %1712 = vmatpush1.bf16.msra.mxu0 %v2357_v26  ;;  %1744 = vmatpush1.bf16.msra.mxu1 %v2366_v29 }
  0xb1   :  { %1714 = vmatprep.subr.bf16.mxu0 %v2380_v33  ;;  %1746 = vmatprep.subr.bf16.mxu1 %v2391_v37 }
  0xb4   :  { %1716 = vmatpush1.bf16.msra.mxu0 %v2393_v38  ;;  %1748 = vmatpush1.bf16.msra.mxu1 %v2405_v42 }
  0xb5   :  { %1718 = vmatprep.subr.bf16.mxu0 %v2419_v47  ;;  %1750 = vmatprep.subr.bf16.mxu1 %v2421_v48 }
  0xb8   :  { %1720 = vmatpush1.bf16.msra.mxu0 %v2433_v52  ;;  %1752 = vmatpush1.bf16.msra.mxu1 %v2447_v56 }
  0xb9   :  { %1722 = vmatprep.subr.bf16.mxu0 %v2449_v57  ;;  %1754 = vmatprep.subr.bf16.mxu1 %v2460_v61 }
  0xbc   :  { %1724 = vmatpush1.bf16.msra.mxu0 %v2472_v1  ;;  %1756 = vmatpush1.bf16.msra.mxu1 %v2485_v5 }
  0xbd   :  { %1726 = vmatprep.subr.bf16.mxu0 %v2487_v6  ;;  %1758 = vmatprep.subr.bf16.mxu1 %v2499_v11 }
  0xc0   :  { %1728 = vmatpush1.bf16.msra.mxu0 %v2520_v22  ;;  %1760 = vmatpush1.bf16.msra.mxu1 %v2524_v23 }
  0xc1   :  { %1730 = vmatprep.subr.bf16.mxu0 %v2526_v24  ;;  %1762 = vmatprep.subr.bf16.mxu1 %v2538_v31 }
  0xc4   :  { %1732 = vmatpush1.bf16.msra.mxu0 %v2556_v40  ;;  %1764 = vmatpush1.bf16.msra.mxu1 %v2560_v41 }
  0xc5   :  { %1734 = vmatprep.subr.bf16.mxu0 %v2562_v43  ;;  %1766 = vmatprep.subr.bf16.mxu1 %v2571_v49 }
  0xc8   :  { %1736 = vmatpush1.bf16.msra.mxu0 %v2580_v53  ;;  %1768 = vmatpush1.bf16.msra.mxu1 %v2584_v54 }
  0xc9   :  { %1770 = vmatprep.subr.bf16.mxu0 %v2302_v7  ;;  %1802 = vmatprep.subr.bf16.mxu1 %v2316_v12 }
 0x17e   :  { %v253_v60 = vpop.f32.mrb[0].mxu0  ;;  %v324_v62 = vpop.f32.mrb[0].mxu1 }
 0x17f   :  { %v329_v0 = vadd.f32 %v253_v60, %v183_v58  ;;  %v255_v4 = vpop.f32.mrb[1].mxu0  ;;  %v326_v14 = vpop.f32.mrb[1].mxu1  ;;  %v331_v30 = vadd.f32 %v324_v62, %v185_v27 }
 0x180   :  { %v330_v15 = vadd.f32 %v255_v4, %v184_v63  ;;  %v332_v35 = vadd.f32 %v326_v14, %v186_v32 }
 0x181   :  { %v333_v21 = vmul.f32 0.5, %v329_v0 }
 0x182   :  { %v337_v55 = vmul.f32 0.5, %v330_v15  ;;  %v342_v36 = vmul.f32 0.5, %v332_v35 }
 0x183   :  { %2167 = vtanh.f32 %v333_v21 }
 0x184   :  { %2169 = vtanh.f32 %v337_v55 }
 0x185   :  { %2171 = vtanh.f32 %v331_v30 }
 0x186   :  { %2173 = vtanh.f32 %v342_v36 }
 0x18d   :  { %v2168_v39 = vpop.eup %2167 }
 0x18e   :  { %v2170_v44 = vpop.eup %2169  ;;  %v335_v50 = vmul.f32 0.5, %v2168_v39 }
 0x18f   :  { %v339_v51 = vmul.f32 0.5, %v2170_v44  ;;  %v2172_v60 = vpop.eup %2171 }
 0x190   :  { %v336_v58 = vadd.f32 0.5, %v335_v50  ;;  %v2174_v62 = vpop.eup %2173 }
 0x191   :  { %v340_v63 = vadd.f32 0.5, %v339_v51  ;;  %v344_v4 = vmul.f32 0.5, %v2174_v62 }
 0x192   :  { %v347_v59 = vmul.f32 %v2172_v60, %v336_v58 }
 0x193   :  { %v346_v45 = vmul.f32 %v340_v63, %v2622_v17  ;;  %v345_v15 = vadd.f32 0.5, %v344_v4  ;;  %v356_v17 = vpop.permute.xlu1 %355 }
 0x194   :  { %v358_v27 = vmul.f32 %v356_v17, %v2597_v2  ;;  %v359_v28 = vmul.f32 %v356_v17, %v2599_v3  ;;  %v360_v30 = vmul.f32 %v356_v17, %v2601_v8  ;;  %v361_v51 = vmul.f32 %v356_v17, %v2609_v18 }
 0x195   :  { %v2679_v0 = vadd.f32 %v347_v59, %v346_v45 }
 0x196   :  { %v362_v55 = vadd.f32 %v358_v27, %v2603_v9  ;;  %v363_v32 = vadd.f32 %v359_v28, %v2605_v10  ;;  %v364_v44 = vadd.f32 %v360_v30, %v2611_v19  ;;  %v365_v62 = vadd.f32 %v361_v51, %v2616_v34 }
 0x197   :  { %2175 = vtanh.f32 %v2679_v0 }
 0x1a1   :  { %v2176_v14 = vpop.eup %2175 }
 0x1a2   :  { %v350_v21 = vmul.f32 %v2176_v14, %v345_v15 }
 0x1a4   :  { %431 = vmatmul.mubr.f32.vlgmr.msra.gmra.mrb[2].mxu0 %v350_v21  ;;  %502 = vmatmul.mubr.f32.vlgmr.msra.gmra.mrb[2].mxu1 %v350_v21 }
 0x1a5   :  { %1772 = vmatpush1.bf16.msra.mxu0 %v2318_v13  ;;  %1804 = vmatpush1.bf16.msra.mxu1 %v2327_v16 }
 0x1a6   :  { %1774 = vmatprep.subr.bf16.mxu0 %v2341_v20  ;;  %1806 = vmatprep.subr.bf16.mxu1 %v2355_v25 }
 0x1a7   :  { %609 = vmatprep.mubr.f32.mxu0 %v2248_v46  ;;  %680 = vmatprep.mubr.f32.mxu1 %v2248_v46 }
 0x1a9   :  { %1776 = vmatpush1.bf16.msra.mxu0 %v2357_v26  ;;  %1808 = vmatpush1.bf16.msra.mxu1 %v2366_v29 }
 0x1aa   :  { %1778 = vmatprep.subr.bf16.mxu0 %v2380_v33  ;;  %1810 = vmatprep.subr.bf16.mxu1 %v2391_v37 }
 0x1ad   :  { %1780 = vmatpush1.bf16.msra.mxu0 %v2393_v38  ;;  %1812 = vmatpush1.bf16.msra.mxu1 %v2405_v42 }
 0x1ae   :  { %1782 = vmatprep.subr.bf16.mxu0 %v2419_v47  ;;  %1814 = vmatprep.subr.bf16.mxu1 %v2421_v48 }
 0x1b1   :  { %1784 = vmatpush1.bf16.msra.mxu0 %v2433_v52  ;;  %1816 = vmatpush1.bf16.msra.mxu1 %v2447_v56 }
 0x1b2   :  { %1786 = vmatprep.subr.bf16.mxu0 %v2449_v57  ;;  %1818 = vmatprep.subr.bf16.mxu1 %v2460_v61 }
 0x1b5   :  { %1788 = vmatpush1.bf16.msra.mxu0 %v2472_v1  ;;  %1820 = vmatpush1.bf16.msra.mxu1 %v2485_v5 }
 0x1b6   :  { %1790 = vmatprep.subr.bf16.mxu0 %v2487_v6  ;;  %1822 = vmatprep.subr.bf16.mxu1 %v2499_v11 }
 0x1b9   :  { %1792 = vmatpush1.bf16.msra.mxu0 %v2520_v22  ;;  %1824 = vmatpush1.bf16.msra.mxu1 %v2524_v23 }
 0x1ba   :  { %1794 = vmatprep.subr.bf16.mxu0 %v2526_v24  ;;  %1826 = vmatprep.subr.bf16.mxu1 %v2538_v31 }
 0x1bd   :  { %1796 = vmatpush1.bf16.msra.mxu0 %v2556_v40  ;;  %1828 = vmatpush1.bf16.msra.mxu1 %v2560_v41 }
 0x1be   :  { %1798 = vmatprep.subr.bf16.mxu0 %v2562_v43  ;;  %1830 = vmatprep.subr.bf16.mxu1 %v2571_v49 }
 0x1c1   :  { %1800 = vmatpush1.bf16.msra.mxu0 %v2580_v53  ;;  %1832 = vmatpush1.bf16.msra.mxu1 %v2584_v54 }
 0x1c2   :  { %1834 = vmatprep.subr.bf16.mxu0 %v2302_v7  ;;  %1866 = vmatprep.subr.bf16.mxu1 %v2316_v12 }
 0x277   :  { %v432_v35 = vpop.f32.mrb[2].mxu0  ;;  %v503_v36 = vpop.f32.mrb[2].mxu1 }
 0x278   :  { %v508_v39 = vadd.f32 %v432_v35, %v362_v55  ;;  %v434_v50 = vpop.f32.mrb[3].mxu0  ;;  %v505_v58 = vpop.f32.mrb[3].mxu1  ;;  %v510_v45 = vadd.f32 %v503_v36, %v364_v44 }
 0x279   :  { %v509_v60 = vadd.f32 %v434_v50, %v363_v32  ;;  %v511_v4 = vadd.f32 %v505_v58, %v365_v62 }
 0x27a   :  { %v512_v63 = vmul.f32 0.5, %v508_v39 }
 0x27b   :  { %v516_v59 = vmul.f32 0.5, %v509_v60  ;;  %v521_v15 = vmul.f32 0.5, %v511_v4 }
 0x27c   :  { %2177 = vtanh.f32 %v512_v63 }
 0x27d   :  { %2179 = vtanh.f32 %v516_v59 }
 0x27e   :  { %2181 = vtanh.f32 %v510_v45 }
 0x27f   :  { %2183 = vtanh.f32 %v521_v15 }
 0x286   :  { %v2178_v14 = vpop.eup %2177 }
 0x287   :  { %v2180_v21 = vpop.eup %2179  ;;  %v514_v27 = vmul.f32 0.5, %v2178_v14 }
 0x288   :  { %v518_v28 = vmul.f32 0.5, %v2180_v21  ;;  %v2182_v30 = vpop.eup %2181 }
 0x289   :  { %v515_v55 = vadd.f32 0.5, %v514_v27  ;;  %v2184_v36 = vpop.eup %2183 }
 0x28a   :  { %v519_v17 = vadd.f32 0.5, %v518_v28  ;;  %v523_v44 = vmul.f32 0.5, %v2184_v36 }
 0x28b   :  { %v526_v35 = vmul.f32 %v2182_v30, %v515_v55 }
 0x28c   :  { %v525_v32 = vmul.f32 %v519_v17, %v2679_v0  ;;  %v524_v50 = vadd.f32 0.5, %v523_v44  ;;  %v535_v0 = vpop.permute.xlu1 %534 }
 0x28d   :  { %v537_v60 = vmul.f32 %v535_v0, %v2597_v2  ;;  %v538_v63 = vmul.f32 %v535_v0, %v2599_v3  ;;  %v539_v45 = vmul.f32 %v535_v0, %v2601_v8  ;;  %v540_v17 = vmul.f32 %v535_v0, %v2609_v18 }
 0x28e   :  { %v2725_v39 = vadd.f32 %v526_v35, %v525_v32 }
 0x28f   :  { %v541_v59 = vadd.f32 %v537_v60, %v2603_v9  ;;  %v542_v15 = vadd.f32 %v538_v63, %v2605_v10  ;;  %v543_v30 = vadd.f32 %v539_v45, %v2611_v19  ;;  %v544_v36 = vadd.f32 %v540_v17, %v2616_v34 }
 0x290   :  { %2185 = vtanh.f32 %v2725_v39 }
 0x29a   :  { %v2186_v51 = vpop.eup %2185 }
 0x29b   :  { %v529_v58 = vmul.f32 %v2186_v51, %v524_v50 }
 0x29d   :  { %610 = vmatmul.mubr.f32.vlgmr.msra.gmra.mrb[4].mxu0 %v529_v58  ;;  %681 = vmatmul.mubr.f32.vlgmr.msra.gmra.mrb[4].mxu1 %v529_v58 }
 0x29e   :  { %1836 = vmatpush1.bf16.msra.mxu0 %v2318_v13  ;;  %1868 = vmatpush1.bf16.msra.mxu1 %v2327_v16 }
 0x29f   :  { %1838 = vmatprep.subr.bf16.mxu0 %v2341_v20  ;;  %1870 = vmatprep.subr.bf16.mxu1 %v2355_v25 }
 0x2a0   :  { %788 = vmatprep.mubr.f32.mxu0 %v2248_v46  ;;  %859 = vmatprep.mubr.f32.mxu1 %v2248_v46 }
 0x2a2   :  { %1840 = vmatpush1.bf16.msra.mxu0 %v2357_v26  ;;  %1872 = vmatpush1.bf16.msra.mxu1 %v2366_v29 }
 0x2a3   :  { %1842 = vmatprep.subr.bf16.mxu0 %v2380_v33  ;;  %1874 = vmatprep.subr.bf16.mxu1 %v2391_v37 }
 0x2a6   :  { %1844 = vmatpush1.bf16.msra.mxu0 %v2393_v38  ;;  %1876 = vmatpush1.bf16.msra.mxu1 %v2405_v42 }
 0x2a7   :  { %1846 = vmatprep.subr.bf16.mxu0 %v2419_v47  ;;  %1878 = vmatprep.subr.bf16.mxu1 %v2421_v48 }
 0x2aa   :  { %1848 = vmatpush1.bf16.msra.mxu0 %v2433_v52  ;;  %1880 = vmatpush1.bf16.msra.mxu1 %v2447_v56 }
 0x2ab   :  { %1850 = vmatprep.subr.bf16.mxu0 %v2449_v57  ;;  %1882 = vmatprep.subr.bf16.mxu1 %v2460_v61 }
 0x2ae   :  { %1852 = vmatpush1.bf16.msra.mxu0 %v2472_v1  ;;  %1884 = vmatpush1.bf16.msra.mxu1 %v2485_v5 }
 0x2af   :  { %1854 = vmatprep.subr.bf16.mxu0 %v2487_v6  ;;  %1886 = vmatprep.subr.bf16.mxu1 %v2499_v11 }
 0x2b2   :  { %1856 = vmatpush1.bf16.msra.mxu0 %v2520_v22  ;;  %1888 = vmatpush1.bf16.msra.mxu1 %v2524_v23 }
 0x2b3   :  { %1858 = vmatprep.subr.bf16.mxu0 %v2526_v24  ;;  %1890 = vmatprep.subr.bf16.mxu1 %v2538_v31 }
 0x2b6   :  { %1860 = vmatpush1.bf16.msra.mxu0 %v2556_v40  ;;  %1892 = vmatpush1.bf16.msra.mxu1 %v2560_v41 }
 0x2b7   :  { %1862 = vmatprep.subr.bf16.mxu0 %v2562_v43  ;;  %1894 = vmatprep.subr.bf16.mxu1 %v2571_v49 }
 0x2ba   :  { %1864 = vmatpush1.bf16.msra.mxu0 %v2580_v53  ;;  %1896 = vmatpush1.bf16.msra.mxu1 %v2584_v54 }
 0x2bb   :  { %1898 = vmatprep.subr.bf16.mxu0 %v2302_v7  ;;  %1930 = vmatprep.subr.bf16.mxu1 %v2316_v12 }
 0x370   :  { %v611_v62 = vpop.f32.mrb[4].mxu0  ;;  %v682_v4 = vpop.f32.mrb[4].mxu1 }
 0x371   :  { %v687_v14 = vadd.f32 %v611_v62, %v541_v59  ;;  %v613_v21 = vpop.f32.mrb[5].mxu0  ;;  %v684_v27 = vpop.f32.mrb[5].mxu1  ;;  %v689_v32 = vadd.f32 %v682_v4, %v543_v30 }
 0x372   :  { %v688_v28 = vadd.f32 %v613_v21, %v542_v15  ;;  %v690_v44 = vadd.f32 %v684_v27, %v544_v36 }
 0x373   :  { %v691_v55 = vmul.f32 0.5, %v687_v14 }
 0x374   :  { %v695_v35 = vmul.f32 0.5, %v688_v28  ;;  %v700_v50 = vmul.f32 0.5, %v690_v44 }
 0x375   :  { %2187 = vtanh.f32 %v691_v55 }
 0x376   :  { %2189 = vtanh.f32 %v695_v35 }
 0x377   :  { %2191 = vtanh.f32 %v689_v32 }
 0x378   :  { %2193 = vtanh.f32 %v700_v50 }
 0x37f   :  { %v2188_v51 = vpop.eup %2187 }
 0x380   :  { %v2190_v58 = vpop.eup %2189  ;;  %v693_v60 = vmul.f32 0.5, %v2188_v51 }
 0x381   :  { %v697_v63 = vmul.f32 0.5, %v2190_v58  ;;  %v2192_v62 = vpop.eup %2191 }
 0x382   :  { %v694_v59 = vadd.f32 0.5, %v693_v60  ;;  %v2194_v4 = vpop.eup %2193 }
 0x383   :  { %v698_v15 = vadd.f32 0.5, %v697_v63  ;;  %v702_v21 = vmul.f32 0.5, %v2194_v4 }
 0x384   :  { %v705_v45 = vmul.f32 %v2192_v62, %v694_v59 }
 0x385   :  { %v704_v0 = vmul.f32 %v698_v15, %v2725_v39  ;;  %v703_v28 = vadd.f32 0.5, %v702_v21  ;;  %v714_v39 = vpop.permute.xlu0 %713 }
 0x386   :  { %v716_v30 = vmul.f32 %v714_v39, %v2597_v2  ;;  %v717_v17 = vmul.f32 %v714_v39, %v2599_v3  ;;  %v718_v32 = vmul.f32 %v714_v39, %v2601_v8  ;;  %v719_v15 = vmul.f32 %v714_v39, %v2609_v18 }
 0x387   :  { %v2771_v14 = vadd.f32 %v705_v45, %v704_v0 }
 0x388   :  { %v720_v35 = vadd.f32 %v716_v30, %v2603_v9  ;;  %v721_v50 = vadd.f32 %v717_v17, %v2605_v10  ;;  %v722_v62 = vadd.f32 %v718_v32, %v2611_v19  ;;  %v723_v4 = vadd.f32 %v719_v15, %v2616_v34 }
 0x389   :  { %2195 = vtanh.f32 %v2771_v14 }
 0x393   :  { %v2196_v27 = vpop.eup %2195 }
 0x394   :  { %v708_v55 = vmul.f32 %v2196_v27, %v703_v28 }
 0x396   :  { %789 = vmatmul.mubr.f32.vlgmr.msra.gmra.mrb[6].mxu0 %v708_v55  ;;  %860 = vmatmul.mubr.f32.vlgmr.msra.gmra.mrb[6].mxu1 %v708_v55 }
 0x397   :  { %1900 = vmatpush1.bf16.msra.mxu0 %v2318_v13  ;;  %1932 = vmatpush1.bf16.msra.mxu1 %v2327_v16 }
 0x398   :  { %1902 = vmatprep.subr.bf16.mxu0 %v2341_v20  ;;  %1934 = vmatprep.subr.bf16.mxu1 %v2355_v25 }
 0x399   :  { %967 = vmatprep.mubr.f32.mxu0 %v2248_v46  ;;  %1038 = vmatprep.mubr.f32.mxu1 %v2248_v46 }
 0x39b   :  { %1904 = vmatpush1.bf16.msra.mxu0 %v2357_v26  ;;  %1936 = vmatpush1.bf16.msra.mxu1 %v2366_v29 }
 0x39c   :  { %1906 = vmatprep.subr.bf16.mxu0 %v2380_v33  ;;  %1938 = vmatprep.subr.bf16.mxu1 %v2391_v37 }
 0x39f   :  { %1908 = vmatpush1.bf16.msra.mxu0 %v2393_v38  ;;  %1940 = vmatpush1.bf16.msra.mxu1 %v2405_v42 }
 0x3a0   :  { %1910 = vmatprep.subr.bf16.mxu0 %v2419_v47  ;;  %1942 = vmatprep.subr.bf16.mxu1 %v2421_v48 }
 0x3a3   :  { %1912 = vmatpush1.bf16.msra.mxu0 %v2433_v52  ;;  %1944 = vmatpush1.bf16.msra.mxu1 %v2447_v56 }
 0x3a4   :  { %1914 = vmatprep.subr.bf16.mxu0 %v2449_v57  ;;  %1946 = vmatprep.subr.bf16.mxu1 %v2460_v61 }
 0x3a7   :  { %1916 = vmatpush1.bf16.msra.mxu0 %v2472_v1  ;;  %1948 = vmatpush1.bf16.msra.mxu1 %v2485_v5 }
 0x3a8   :  { %1918 = vmatprep.subr.bf16.mxu0 %v2487_v6  ;;  %1950 = vmatprep.subr.bf16.mxu1 %v2499_v11 }
 0x3ab   :  { %1920 = vmatpush1.bf16.msra.mxu0 %v2520_v22  ;;  %1952 = vmatpush1.bf16.msra.mxu1 %v2524_v23 }
 0x3ac   :  { %1922 = vmatprep.subr.bf16.mxu0 %v2526_v24  ;;  %1954 = vmatprep.subr.bf16.mxu1 %v2538_v31 }
 0x3af   :  { %1924 = vmatpush1.bf16.msra.mxu0 %v2556_v40  ;;  %1956 = vmatpush1.bf16.msra.mxu1 %v2560_v41 }
 0x3b0   :  { %1926 = vmatprep.subr.bf16.mxu0 %v2562_v43  ;;  %1958 = vmatprep.subr.bf16.mxu1 %v2571_v49 }
 0x3b3   :  { %1928 = vmatpush1.bf16.msra.mxu0 %v2580_v53  ;;  %1960 = vmatpush1.bf16.msra.mxu1 %v2584_v54 }
 0x3b4   :  { %1962 = vmatprep.subr.bf16.mxu0 %v2302_v7  ;;  %1994 = vmatprep.subr.bf16.mxu1 %v2316_v12 }
 0x469   :  { %v790_v36 = vpop.f32.mrb[6].mxu0  ;;  %v861_v44 = vpop.f32.mrb[6].mxu1 }
 0x46a   :  { %v866_v51 = vadd.f32 %v790_v36, %v720_v35  ;;  %v792_v58 = vpop.f32.mrb[7].mxu0  ;;  %v863_v60 = vpop.f32.mrb[7].mxu1  ;;  %v868_v0 = vadd.f32 %v861_v44, %v722_v62 }
 0x46b   :  { %v867_v63 = vadd.f32 %v792_v58, %v721_v50  ;;  %v869_v21 = vadd.f32 %v863_v60, %v723_v4 }
 0x46c   :  { %v870_v59 = vmul.f32 0.5, %v866_v51 }
 0x46d   :  { %v874_v45 = vmul.f32 0.5, %v867_v63  ;;  %v879_v28 = vmul.f32 0.5, %v869_v21 }
 0x46e   :  { %2197 = vtanh.f32 %v870_v59 }
 0x46f   :  { %2199 = vtanh.f32 %v874_v45 }
 0x470   :  { %2201 = vtanh.f32 %v868_v0 }
 0x471   :  { %2203 = vtanh.f32 %v879_v28 }
 0x478   :  { %v2198_v27 = vpop.eup %2197 }
 0x479   :  { %v2200_v55 = vpop.eup %2199  ;;  %v872_v30 = vmul.f32 0.5, %v2198_v27 }
 0x47a   :  { %v876_v17 = vmul.f32 0.5, %v2200_v55  ;;  %v2202_v36 = vpop.eup %2201 }
 0x47b   :  { %v873_v35 = vadd.f32 0.5, %v872_v30  ;;  %v2204_v44 = vpop.eup %2203 }
 0x47c   :  { %v877_v50 = vadd.f32 0.5, %v876_v17  ;;  %v881_v58 = vmul.f32 0.5, %v2204_v44 }
 0x47d   :  { %v884_v32 = vmul.f32 %v2202_v36, %v873_v35 }
 0x47e   :  { %v883_v39 = vmul.f32 %v877_v50, %v2771_v14  ;;  %v882_v63 = vadd.f32 0.5, %v881_v58  ;;  %v893_v14 = vpop.permute.xlu1 %892 }
 0x47f   :  { %v895_v62 = vmul.f32 %v893_v14, %v2597_v2  ;;  %v896_v15 = vmul.f32 %v893_v14, %v2599_v3  ;;  %v897_v0 = vmul.f32 %v893_v14, %v2601_v8  ;;  %v898_v50 = vmul.f32 %v893_v14, %v2609_v18 }
 0x480   :  { %v2817_v51 = vadd.f32 %v884_v32, %v883_v39 }
 0x481   :  { %v899_v45 = vadd.f32 %v895_v62, %v2603_v9  ;;  %v900_v28 = vadd.f32 %v896_v15, %v2605_v10  ;;  %v901_v36 = vadd.f32 %v897_v0, %v2611_v19  ;;  %v902_v44 = vadd.f32 %v898_v50, %v2616_v34 }
 0x482   :  { %2205 = vtanh.f32 %v2817_v51 }
 0x48c   :  { %v2206_v60 = vpop.eup %2205 }
 0x48d   :  { %v887_v59 = vmul.f32 %v2206_v60, %v882_v63 }
 0x48f   :  { %968 = vmatmul.mubr.f32.vlgmr.msra.gmra.mrb[8].mxu0 %v887_v59  ;;  %1039 = vmatmul.mubr.f32.vlgmr.msra.gmra.mrb[8].mxu1 %v887_v59 }
 0x490   :  { %1964 = vmatpush1.bf16.msra.mxu0 %v2318_v13  ;;  %1996 = vmatpush1.bf16.msra.mxu1 %v2327_v16 }
 0x491   :  { %1966 = vmatprep.subr.bf16.mxu0 %v2341_v20  ;;  %1998 = vmatprep.subr.bf16.mxu1 %v2355_v25 }
 0x492   :  { %1146 = vmatprep.mubr.f32.mxu0 %v2248_v46  ;;  %1217 = vmatprep.mubr.f32.mxu1 %v2248_v46 }
 0x494   :  { %1968 = vmatpush1.bf16.msra.mxu0 %v2357_v26  ;;  %2000 = vmatpush1.bf16.msra.mxu1 %v2366_v29 }
 0x495   :  { %1970 = vmatprep.subr.bf16.mxu0 %v2380_v33  ;;  %2002 = vmatprep.subr.bf16.mxu1 %v2391_v37 }
 0x498   :  { %1972 = vmatpush1.bf16.msra.mxu0 %v2393_v38  ;;  %2004 = vmatpush1.bf16.msra.mxu1 %v2405_v42 }
 0x499   :  { %1974 = vmatprep.subr.bf16.mxu0 %v2419_v47  ;;  %2006 = vmatprep.subr.bf16.mxu1 %v2421_v48 }
 0x49c   :  { %1976 = vmatpush1.bf16.msra.mxu0 %v2433_v52  ;;  %2008 = vmatpush1.bf16.msra.mxu1 %v2447_v56 }
 0x49d   :  { %1978 = vmatprep.subr.bf16.mxu0 %v2449_v57  ;;  %2010 = vmatprep.subr.bf16.mxu1 %v2460_v61 }
 0x4a0   :  { %1980 = vmatpush1.bf16.msra.mxu0 %v2472_v1  ;;  %2012 = vmatpush1.bf16.msra.mxu1 %v2485_v5 }
 0x4a1   :  { %1982 = vmatprep.subr.bf16.mxu0 %v2487_v6  ;;  %2014 = vmatprep.subr.bf16.mxu1 %v2499_v11 }
 0x4a4   :  { %1984 = vmatpush1.bf16.msra.mxu0 %v2520_v22  ;;  %2016 = vmatpush1.bf16.msra.mxu1 %v2524_v23 }
 0x4a5   :  { %1986 = vmatprep.subr.bf16.mxu0 %v2526_v24  ;;  %2018 = vmatprep.subr.bf16.mxu1 %v2538_v31 }
 0x4a8   :  { %1988 = vmatpush1.bf16.msra.mxu0 %v2556_v40  ;;  %2020 = vmatpush1.bf16.msra.mxu1 %v2560_v41 }
 0x4a9   :  { %1990 = vmatprep.subr.bf16.mxu0 %v2562_v43  ;;  %2022 = vmatprep.subr.bf16.mxu1 %v2571_v49 }
 0x4ac   :  { %1992 = vmatpush1.bf16.msra.mxu0 %v2580_v53  ;;  %2024 = vmatpush1.bf16.msra.mxu1 %v2584_v54 }
 0x4ad   :  { %2026 = vmatprep.subr.bf16.mxu0 %v2302_v7  ;;  %2058 = vmatprep.subr.bf16.mxu1 %v2316_v12 }
 0x562   :  { %v969_v4 = vpop.f32.mrb[8].mxu0  ;;  %v1040_v21 = vpop.f32.mrb[8].mxu1 }
 0x563   :  { %v1045_v27 = vadd.f32 %v969_v4, %v899_v45  ;;  %v971_v55 = vpop.f32.mrb[9].mxu0  ;;  %v1042_v30 = vpop.f32.mrb[9].mxu1  ;;  %v1047_v39 = vadd.f32 %v1040_v21, %v901_v36 }
 0x564   :  { %v1046_v17 = vadd.f32 %v971_v55, %v900_v28  ;;  %v1048_v58 = vadd.f32 %v1042_v30, %v902_v44 }
 0x565   :  { %v1049_v35 = vmul.f32 0.5, %v1045_v27 }
 0x566   :  { %v1053_v32 = vmul.f32 0.5, %v1046_v17  ;;  %v1058_v63 = vmul.f32 0.5, %v1048_v58 }
 0x567   :  { %2207 = vtanh.f32 %v1049_v35 }
 0x568   :  { %2209 = vtanh.f32 %v1053_v32 }
 0x569   :  { %2211 = vtanh.f32 %v1047_v39 }
 0x56a   :  { %2213 = vtanh.f32 %v1058_v63 }
 0x571   :  { %v2208_v60 = vpop.eup %2207 }
 0x572   :  { %v2210_v59 = vpop.eup %2209  ;;  %v1051_v62 = vmul.f32 0.5, %v2208_v60 }
 0x573   :  { %v1055_v15 = vmul.f32 0.5, %v2210_v59  ;;  %v2212_v4 = vpop.eup %2211 }
 0x574   :  { %v1052_v45 = vadd.f32 0.5, %v1051_v62  ;;  %v2214_v21 = vpop.eup %2213 }
 0x575   :  { %v1056_v28 = vadd.f32 0.5, %v1055_v15  ;;  %v1060_v55 = vmul.f32 0.5, %v2214_v21 }
 0x576   :  { %v1063_v0 = vmul.f32 %v2212_v4, %v1052_v45 }
 0x577   :  { %v1062_v14 = vmul.f32 %v1056_v28, %v2817_v51  ;;  %v1061_v17 = vadd.f32 0.5, %v1060_v55  ;;  %v1072_v51 = vpop.permute.xlu0 %1071 }
 0x578   :  { %v1074_v36 = vmul.f32 %v1072_v51, %v2597_v2  ;;  %v1075_v50 = vmul.f32 %v1072_v51, %v2599_v3  ;;  %v1076_v39 = vmul.f32 %v1072_v51, %v2601_v8  ;;  %v1077_v45 = vmul.f32 %v1072_v51, %v2609_v18 }
 0x579   :  { %v2863_v27 = vadd.f32 %v1063_v0, %v1062_v14 }
 0x57a   :  { %v1078_v32 = vadd.f32 %v1074_v36, %v2603_v9  ;;  %v1079_v63 = vadd.f32 %v1075_v50, %v2605_v10  ;;  %v1081_v0 = vadd.f32 %v1077_v45, %v2616_v34  ;;  %v11_v45 = vstv %s2974_s5 }
 0x57b   :  { %2215 = vtanh.f32 %v2863_v27  ;;  %12 = vst [vmem:[#allocation2] sm:$0x1] %v11_v45 }
 0x585   :  { %v2216_v30 = vpop.eup %2215 }
 0x586   :  { %v1066_v35 = vmul.f32 %v2216_v30, %v1061_v17 }
 0x588   :  { %1147 = vmatmul.mubr.f32.vlgmr.msra.gmra.mrb[10].mxu0 %v1066_v35  ;;  %1218 = vmatmul.mubr.f32.vlgmr.msra.gmra.mrb[10].mxu1 %v1066_v35 }
 0x589   :  { %2028 = vmatpush1.bf16.msra.mxu0 %v2318_v13  ;;  %2060 = vmatpush1.bf16.msra.mxu1 %v2327_v16 }
 0x58a   :  { %2030 = vmatprep.subr.bf16.mxu0 %v2341_v20  ;;  %2062 = vmatprep.subr.bf16.mxu1 %v2355_v25 }
 0x58b   :  { %1325 = vmatprep.mubr.f32.mxu0 %v2248_v46  ;;  %1396 = vmatprep.mubr.f32.mxu1 %v2248_v46 }
 0x58d   :  { %2032 = vmatpush1.bf16.msra.mxu0 %v2357_v26  ;;  %2064 = vmatpush1.bf16.msra.mxu1 %v2366_v29 }
 0x58e   :  { %2034 = vmatprep.subr.bf16.mxu0 %v2380_v33  ;;  %2066 = vmatprep.subr.bf16.mxu1 %v2391_v37 }
 0x591   :  { %2036 = vmatpush1.bf16.msra.mxu0 %v2393_v38  ;;  %2068 = vmatpush1.bf16.msra.mxu1 %v2405_v42 }
 0x592   :  { %2038 = vmatprep.subr.bf16.mxu0 %v2419_v47  ;;  %2070 = vmatprep.subr.bf16.mxu1 %v2421_v48 }
 0x595   :  { %2040 = vmatpush1.bf16.msra.mxu0 %v2433_v52  ;;  %2072 = vmatpush1.bf16.msra.mxu1 %v2447_v56 }
 0x596   :  { %2042 = vmatprep.subr.bf16.mxu0 %v2449_v57  ;;  %2074 = vmatprep.subr.bf16.mxu1 %v2460_v61 }
 0x599   :  { %2044 = vmatpush1.bf16.msra.mxu0 %v2472_v1  ;;  %2076 = vmatpush1.bf16.msra.mxu1 %v2485_v5 }
 0x59a   :  { %2046 = vmatprep.subr.bf16.mxu0 %v2487_v6  ;;  %2078 = vmatprep.subr.bf16.mxu1 %v2499_v11 }
 0x59d   :  { %2048 = vmatpush1.bf16.msra.mxu0 %v2520_v22  ;;  %2080 = vmatpush1.bf16.msra.mxu1 %v2524_v23 }
 0x59e   :  { %2050 = vmatprep.subr.bf16.mxu0 %v2526_v24  ;;  %2082 = vmatprep.subr.bf16.mxu1 %v2538_v31 }
 0x5a1   :  { %2052 = vmatpush1.bf16.msra.mxu0 %v2556_v40  ;;  %2084 = vmatpush1.bf16.msra.mxu1 %v2560_v41 }
 0x5a2   :  { %2054 = vmatprep.subr.bf16.mxu0 %v2562_v43  ;;  %2086 = vmatprep.subr.bf16.mxu1 %v2571_v49 }
 0x5a5   :  { %2056 = vmatpush1.bf16.msra.mxu0 %v2580_v53  ;;  %2088 = vmatpush1.bf16.msra.mxu1 %v2584_v54 }
 0x5a6   :  { %2090 = vmatprep.subr.bf16.mxu0 %v2302_v7  ;;  %2122 = vmatprep.subr.bf16.mxu1 %v2316_v12  ;;  %v1080_v12 = vadd.f32 %v1076_v39, %v2611_v19 }
 0x65b   :  { %v1148_v44 = vpop.f32.mrb[10].mxu0  ;;  %v1219_v58 = vpop.f32.mrb[10].mxu1 }
 0x65c   :  { %v1224_v60 = vadd.f32 %v1148_v44, %v1078_v32  ;;  %v1150_v59 = vpop.f32.mrb[11].mxu0  ;;  %v1221_v62 = vpop.f32.mrb[11].mxu1  ;;  %v1226_v28 = vadd.f32 %v1219_v58, %v1080_v12 }
 0x65d   :  { %v1225_v15 = vadd.f32 %v1150_v59, %v1079_v63  ;;  %v1227_v14 = vadd.f32 %v1221_v62, %v1081_v0 }
 0x65e   :  { %v1228_v7 = vmul.f32 0.5, %v1224_v60 }
 0x65f   :  { %v1232_v4 = vmul.f32 0.5, %v1225_v15  ;;  %v1237_v21 = vmul.f32 0.5, %v1227_v14 }
 0x660   :  { %2217 = vtanh.f32 %v1228_v7 }
 0x661   :  { %2219 = vtanh.f32 %v1232_v4  ;;  %v1430_v4 = vpop.permute.xlu0 %1429 }
 0x662   :  { %2221 = vtanh.f32 %v1226_v28  ;;  %v1432_v28 = vmul.f32 %v1430_v4, %v2597_v2  ;;  %v1433_v0 = vmul.f32 %v1430_v4, %v2599_v3  ;;  %v1434_v14 = vmul.f32 %v1430_v4, %v2601_v8 }
 0x663   :  { %2223 = vtanh.f32 %v1237_v21 }
 0x664   :  { %v1436_v21 = vadd.f32 %v1432_v28, %v2603_v9 }
 0x66a   :  { %v2218_v55 = vpop.eup %2217 }
 0x66b   :  { %v2220_v17 = vpop.eup %2219  ;;  %v1230_v30 = vmul.f32 0.5, %v2218_v55 }
 0x66c   :  { %v1234_v35 = vmul.f32 0.5, %v2220_v17  ;;  %v2222_v50 = vpop.eup %2221 }
 0x66d   :  { %v1231_v36 = vadd.f32 0.5, %v1230_v30  ;;  %v2224_v58 = vpop.eup %2223  ;;  %v1437_v30 = vadd.f32 %v1433_v0, %v2605_v10 }
 0x66e   :  { %v1235_v32 = vadd.f32 0.5, %v1234_v35  ;;  %v1239_v63 = vmul.f32 0.5, %v2224_v58 }
 0x66f   :  { %v1242_v39 = vmul.f32 %v2222_v50, %v1231_v36 }
 0x670   :  { %v1241_v51 = vmul.f32 %v1235_v32, %v2863_v27  ;;  %v1240_v60 = vadd.f32 0.5, %v1239_v63 }
 0x672   :  { %v2909_v44 = vadd.f32 %v1242_v39, %v1241_v51  ;;  %v1435_v39 = vmul.f32 %v1430_v4, %v2609_v18 }
 0x674   :  { %2225 = vtanh.f32 %v2909_v44 }
 0x67e   :  { %v2226_v59 = vpop.eup %2225 }
 0x67f   :  { %v1245_v62 = vmul.f32 %v2226_v59, %v1240_v60 }
 0x681   :  { %1326 = vmatmul.mubr.f32.vlgmr.msra.gmra.mrb[12].mxu0 %v1245_v62  ;;  %1397 = vmatmul.mubr.f32.vlgmr.msra.gmra.mrb[12].mxu1 %v1245_v62 }
 0x682   :  { %2092 = vmatpush1.bf16.msra.mxu0 %v2318_v13  ;;  %2124 = vmatpush1.bf16.msra.mxu1 %v2327_v16  ;;  %v1251_v13 = vpop.permute.xlu1 %1250 }
 0x683   :  { %2094 = vmatprep.subr.bf16.mxu0 %v2341_v20  ;;  %2126 = vmatprep.subr.bf16.mxu1 %v2355_v25  ;;  %v1253_v16 = vmul.f32 %v1251_v13, %v2597_v2  ;;  %v1254_v20 = vmul.f32 %v1251_v13, %v2599_v3 }
 0x684   :  { %1504 = vmatprep.mubr.f32.mxu0 %v2248_v46  ;;  %1575 = vmatprep.mubr.f32.mxu1 %v2248_v46 }
 0x685   :  { %v1257_v25 = vadd.f32 %v1253_v16, %v2603_v9 }
 0x686   :  { %2096 = vmatpush1.bf16.msra.mxu0 %v2357_v26  ;;  %2128 = vmatpush1.bf16.msra.mxu1 %v2366_v29  ;;  %v1255_v26 = vmul.f32 %v1251_v13, %v2601_v8  ;;  %v1439_v8 = vadd.f32 %v1435_v39, %v2616_v34 }
 0x687   :  { %2098 = vmatprep.subr.bf16.mxu0 %v2380_v33  ;;  %2130 = vmatprep.subr.bf16.mxu1 %v2391_v37  ;;  %v1258_v37 = vadd.f32 %v1254_v20, %v2605_v10 }
 0x68a   :  { %2100 = vmatpush1.bf16.msra.mxu0 %v2393_v38  ;;  %2132 = vmatpush1.bf16.msra.mxu1 %v2405_v42 }
 0x68b   :  { %2102 = vmatprep.subr.bf16.mxu0 %v2419_v47  ;;  %2134 = vmatprep.subr.bf16.mxu1 %v2421_v48 }
 0x68e   :  { %2104 = vmatpush1.bf16.msra.mxu0 %v2433_v52  ;;  %2136 = vmatpush1.bf16.msra.mxu1 %v2447_v56  ;;  %v1259_v52 = vadd.f32 %v1255_v26, %v2611_v19  ;;  %v1256_v56 = vmul.f32 %v1251_v13, %v2609_v18 }
 0x68f   :  { %2106 = vmatprep.subr.bf16.mxu0 %v2449_v57  ;;  %2138 = vmatprep.subr.bf16.mxu1 %v2460_v61 }
 0x692   :  { %2108 = vmatpush1.bf16.msra.mxu0 %v2472_v1  ;;  %2140 = vmatpush1.bf16.msra.mxu1 %v2485_v5  ;;  %v1260_v1 = vadd.f32 %v1256_v56, %v2616_v34  ;;  %v1639_v34 = vld [vmem:[%s2975_s4] ss:$0 sm:$0xff] }
 0x693   :  { %2110 = vmatprep.subr.bf16.mxu0 %v2487_v6  ;;  %2142 = vmatprep.subr.bf16.mxu1 %v2499_v11 }
 0x696   :  { %2112 = vmatpush1.bf16.msra.mxu0 %v2520_v22  ;;  %2144 = vmatpush1.bf16.msra.mxu1 %v2524_v23 }
 0x697   :  { %2114 = vmatprep.subr.bf16.mxu0 %v2526_v24  ;;  %2146 = vmatprep.subr.bf16.mxu1 %v2538_v31 }
 0x69a   :  { %2116 = vmatpush1.bf16.msra.mxu0 %v2556_v40  ;;  %2148 = vmatpush1.bf16.msra.mxu1 %v2560_v41 }
 0x69b   :  { %2118 = vmatprep.subr.bf16.mxu0 %v2562_v43  ;;  %2150 = vmatprep.subr.bf16.mxu1 %v2571_v49 }
 0x69e   :  { %2120 = vmatpush1.bf16.msra.mxu0 %v2580_v53  ;;  %2152 = vmatpush1.bf16.msra.mxu1 %v2584_v54 }
 0x754   :  { %v1327_v29 = vpop.f32.mrb[12].mxu0  ;;  %v1398_v33 = vpop.f32.mrb[12].mxu1 }
 0x755   :  { %v1403_v38 = vadd.f32 %v1327_v29, %v1257_v25  ;;  %v1329_v42 = vpop.f32.mrb[13].mxu0  ;;  %v1400_v46 = vpop.f32.mrb[13].mxu1  ;;  %v1405_v61 = vadd.f32 %v1398_v33, %v1259_v52 }
 0x756   :  { %v1404_v47 = vadd.f32 %v1329_v42, %v1258_v37  ;;  %v1406_v5 = vadd.f32 %v1400_v46, %v1260_v1  ;;  %v1640_v46 = vld [vmem:[#allocation2] ss:$0 sm:$0xff] }
 0x757   :  { %v1407_v48 = vmul.f32 0.5, %v1403_v38 }
 0x758   :  { %v1411_v57 = vmul.f32 0.5, %v1404_v47  ;;  %v1416_v6 = vmul.f32 0.5, %v1406_v5 }
 0x759   :  { %2227 = vtanh.f32 %v1407_v48 }
 0x75a   :  { %2229 = vtanh.f32 %v1411_v57 }
 0x75b   :  { %2231 = vtanh.f32 %v1405_v61 }
 0x75c   :  { %2233 = vtanh.f32 %v1416_v6 }
 0x763   :  { %v2228_v11 = vpop.eup %2227 }
 0x764   :  { %v2230_v22 = vpop.eup %2229  ;;  %v1409_v23 = vmul.f32 0.5, %v2228_v11 }
 0x765   :  { %v1413_v24 = vmul.f32 0.5, %v2230_v22  ;;  %v2232_v40 = vpop.eup %2231 }
 0x766   :  { %v1410_v31 = vadd.f32 0.5, %v1409_v23  ;;  %v2234_v54 = vpop.eup %2233 }
 0x767   :  { %v1414_v41 = vadd.f32 0.5, %v1413_v24  ;;  %v1418_v27 = vmul.f32 0.5, %v2234_v54 }
 0x768   :  { %v1421_v43 = vmul.f32 %v2232_v40, %v1410_v31 }
 0x769   :  { %v1420_v49 = vmul.f32 %v1414_v41, %v2909_v44  ;;  %v1419_v15 = vadd.f32 0.5, %v1418_v27  ;;  %v1438_v44 = vadd.f32 %v1434_v14, %v2611_v19 }
 0x76b   :  { %v1422_v53 = vadd.f32 %v1421_v43, %v1420_v49 }
 0x76d   :  { %2235 = vtanh.f32 %v1422_v53 }
 0x777   :  { %v2236_v7 = vpop.eup %2235 }
 0x778   :  { %v1424_v12 = vmul.f32 %v2236_v7, %v1419_v15 }
 0x77a   :  { %1505 = vmatmul.mubr.f32.vlgmr.msra.gmra.mrb[14].mxu0 %v1424_v12  ;;  %1576 = vmatmul.mubr.f32.vlgmr.msra.gmra.mrb[14].mxu1 %v1424_v12 }
 0x84d   :  { %v1506_v55 = vpop.f32.mrb[14].mxu0  ;;  %v1577_v17 = vpop.f32.mrb[14].mxu1 }
 0x84e   :  { %v1582_v35 = vadd.f32 %v1506_v55, %v1436_v21  ;;  %v1508_v36 = vpop.f32.mrb[15].mxu0  ;;  %v1579_v50 = vpop.f32.mrb[15].mxu1  ;;  %v1584_v3 = vadd.f32 %v1577_v17, %v1438_v44 }
 0x84f   :  { %v1583_v32 = vadd.f32 %v1508_v36, %v1437_v30  ;;  %v1585_v9 = vadd.f32 %v1579_v50, %v1439_v8 }
 0x850   :  { %v1586_v51 = vmul.f32 0.5, %v1582_v35 }
 0x851   :  { %v1590_v2 = vmul.f32 0.5, %v1583_v32  ;;  %v1595_v58 = vmul.f32 0.5, %v1585_v9 }
 0x852   :  { %2237 = vtanh.f32 %v1586_v51 }
 0x853   :  { %2239 = vtanh.f32 %v1590_v2 }
 0x854   :  { %2241 = vtanh.f32 %v1584_v3 }
 0x855   :  { %2243 = vtanh.f32 %v1595_v58 }
 0x85c   :  { %v2238_v63 = vpop.eup %2237 }
 0x85d   :  { %v2240_v10 = vpop.eup %2239  ;;  %v1588_v60 = vmul.f32 0.5, %v2238_v63 }
 0x85e   :  { %v1592_v59 = vmul.f32 0.5, %v2240_v10  ;;  %v2242_v13 = vpop.eup %2241 }
 0x85f   :  { %v1589_v62 = vadd.f32 0.5, %v1588_v60  ;;  %v2244_v25 = vpop.eup %2243 }
 0x860   :  { %v1593_v18 = vadd.f32 0.5, %v1592_v59  ;;  %v1597_v26 = vmul.f32 0.5, %v2244_v25 }
 0x861   :  { %v1600_v16 = vmul.f32 %v2242_v13, %v1589_v62 }
 0x862   :  { %v1599_v20 = vmul.f32 %v1593_v18, %v1422_v53  ;;  %v1598_v29 = vadd.f32 0.5, %v1597_v26 }
 0x864   :  { %v1601_v19 = vadd.f32 %v1600_v16, %v1599_v20 }
 0x866   :  { %2245 = vtanh.f32 %v1601_v19 }
 0x870   :  { %v2246_v33 = vpop.eup %2245 }
 0x871   :  { %v1603_v37 = vmul.f32 %v2246_v33, %v1598_v29 }
 0x873   :  { %v1611_v38 = vmul.f32 %v1639_v34, %v1603_v37 }
 0x875   :  { %v1613_v42 = vsel %vm1612_vm1, %v1611_v38, 0.0 }
 0x876   :  { %1614 = vadd.xlane.f32.xlu1 %v1613_v42 }
 0x903   :  { %v1615_v47 = vpop.xlane.xlu1 %1614 }
 0x904   :  { %v1623_v48 = vadd.f32 %v1640_v46, %v1615_v47 }
 0x906   :  { %1625 = vst.msk [vmem:[%s2976_s6] sm:$0x3] %vm1624_vm2, %v1623_v48 }

</bundles_post_ra>
